<compile_context>
chip_gen: v6e
topology: v6e:2x2x1
jax: 0.10.0
libtpu: 0.0.40
codegen_flags: <defaults>
</compile_context>

<pallas_src>
import functools

import jax
import jax.numpy as jnp
import numpy as np
from jax.experimental import pallas as pl
from jax.experimental.pallas import tpu as pltpu


# ---------------------------------------------------------------------------
# Fused per-batch kernel: q/k/v 1x1 conv + permutes + attention
# ---------------------------------------------------------------------------
def _fused_kernel(x_ref, w_ref, b_ref, attn_ref, q_ref, conv_s, qkv3, qkvT, *,
                  cq, hdim, wdim):
    """Per-batch fused Horizontal_Attention.

    x_ref    : (1, C, H*W)   input slab, natural (h, w) raster (lane = H*W)
    w_ref    : (3*CQ, C)     concatenated q/k/v 1x1-conv weights
    b_ref    : (3*CQ, 1)     concatenated q/k/v 1x1-conv biases
    attn_ref : (1, N, H)     A^T with N = CQ*W  (host reshapes it to Weight)
    q_ref    : (1, CQ, H*W)  q_conv(input)      (residual term, lane dense)
    conv_s   : (3*CQ, H*W)   VMEM scratch: lane-dense conv result (f32)
    qkv3     : (3*CQ, H, W)  VMEM scratch: per-channel (H, W) views (f32)
    qkvT     : (3*N, H)      VMEM scratch: stacked [qm ; km^T ; vm^T] (bf16)
    """
    n = cq * wdim

    # ---- fused q/k/v 1x1 conv: ONE lane-dense matmul (3CQ, H*W), f32 acc.
    conv_s[...] = (
        jnp.dot(w_ref[...], x_ref[0], preferred_element_type=jnp.float32)
        + b_ref[...]
    )

    # ---- residual path = first CQ channels of the same conv (no duplicate
    # q conv), emitted lane-dense.
    q_ref[0] = conv_s[pl.ds(0, cq), :]

    # ---- (3CQ, H, W) view of the conv result via per-row lane slice copies
    # (plain vst work; no lane-splitting value reshape).  hdim is a short,
    # static trip count -> unrolled on purpose (use lax.fori_loop if large).
    for h in range(hdim):
        qkv3[:, h, :] = conv_s[:, pl.ds(h * wdim, wdim)]

    # ---- permuted (N, H) slab, stored bf16 for the MXU:
    #   qm [(c,w), h] = q[c, h, w]   (query.permute(0,1,3,2).view(N, H))
    #   kmT[(c,w), h] = k[c, h, w]   (key  .permute(0,2,1,3).view(H, N), transposed)
    #   vmT[(c,w), h] = v[c, h, w]
    # TODO(synk): batch these 3*CQ 2-D transposes into one 3-D transpose +
    # leading-dim collapse when Mosaic reshape support permits.
    for p in range(3 * cq):
        qkvT[pl.ds(p * wdim, wdim), :] = qkv3[p].T.astype(jnp.bfloat16)

    qm = qkvT[pl.ds(0, n), :]           # (N, H) bf16
    kmT = qkvT[pl.ds(n, n), :]          # (N, H) bf16
    vmT = qkvT[pl.ds(2 * n, n), :]      # (N, H) bf16

    # ---- S^T = K_m^T . Q_m^T (bf16 in, f32 acc); softmax(dim=1) of the
    # original S becomes a row softmax of st (over the lane axis).
    st = jax.lax.dot_general(
        kmT, qm, (((1,), (1,)), ((), ())),
        preferred_element_type=jnp.float32)             # st[j, i] = S[i, j]
    m = jnp.max(st, axis=-1, keepdims=True)
    e = jnp.exp(st - m)
    pt = e * pl.reciprocal(jnp.sum(e, axis=-1, keepdims=True), approx=True)

    # ---- A^T = P^T . V_m^T (bf16 in, f32 acc)
    attn_ref[0] = jnp.dot(pt.astype(jnp.bfloat16), vmT,
                          preferred_element_type=jnp.float32)   # (N, H)


# ---------------------------------------------------------------------------
# Full forward
# ---------------------------------------------------------------------------
def horizontal_attention(x, wq, bq, wk, bk, wv, bv, delta):
    B, C, H, W = x.shape
    CQ = wq.shape[0]
    N = CQ * W
    HW = H * W

    x2 = x.reshape(B, C, HW)                               # free contiguous view
    wcat = jnp.concatenate([wq, wk, wv], axis=0)           # (3CQ, C)
    bcat = jnp.concatenate([bq, bk, bv], axis=0)           # (3CQ, 1)

    kernel = functools.partial(_fused_kernel, cq=CQ, hdim=H, wdim=W)

    # Per-batch VMEM working set (double-buffered I/O blocks + scratches +
    # the N*N softmax temporaries), with headroom; clamped to sane bounds.
    f32 = 4
    need = f32 * (2 * C * HW + 3 * CQ * C + 3 * CQ          # inputs
                  + 2 * N * H + 2 * CQ * HW                 # outputs
                  + 3 * CQ * HW + 3 * CQ * H * W            # conv_s + qkv3
                  + 4 * N * N)                              # st / e / pt + slack
    need += 2 * 3 * N * H                                   # bf16 qkvT
    vmem_limit = int(min(max(4 * need, 16 * 1024 * 1024), 64 * 1024 * 1024))

    cost = pl.CostEstimate(
        flops=2 * B * (3 * CQ) * C * HW + 4 * B * N * N * H,
        transcendentals=B * N * (N + 1),
        bytes_accessed=f32 * (B * C * HW + 3 * CQ * C + 3 * CQ
                              + B * N * H + B * CQ * HW),
    )

    attn_t, q2 = pl.pallas_call(
        kernel,
        grid=(B,),
        in_specs=[
            pl.BlockSpec((1, C, HW), lambda b: (b, 0, 0)),
            pl.BlockSpec((3 * CQ, C), lambda b: (0, 0)),
            pl.BlockSpec((3 * CQ, 1), lambda b: (0, 0)),
        ],
        out_specs=[
            pl.BlockSpec((1, N, H), lambda b: (b, 0, 0)),
            pl.BlockSpec((1, CQ, HW), lambda b: (b, 0, 0)),
        ],
        out_shape=[
            jax.ShapeDtypeStruct((B, N, H), jnp.float32),
            jax.ShapeDtypeStruct((B, CQ, HW), jnp.float32),
        ],
        scratch_shapes=[
            pltpu.VMEM((3 * CQ, HW), jnp.float32),          # conv_s
            pltpu.VMEM((3 * CQ, H, W), jnp.float32),        # qkv3
            pltpu.VMEM((3 * N, H), jnp.bfloat16),           # qkvT
        ],
        compiler_params=pltpu.CompilerParams(
            dimension_semantics=("parallel",),
            vmem_limit_bytes=vmem_limit),
        cost_estimate=cost,
    )(x2, wcat, bcat)

    # Attention_map.permute(0,2,1).view(B, CQ, H, W): attn_t already is the
    # permuted map; the .view is a contiguous reshape (free on the host).
    # TODO(synk): the final `Weight*delta + q_conv(input)` add is left to one
    # fused XLA elementwise op because the original .view() index scramble
    # only reduces to a simple in-kernel reshape when H == W.
    weight = attn_t.reshape(B, CQ, H, W)
    q4 = q2.reshape(B, CQ, H, W)
    return weight * delta + q4


# ---------------------------------------------------------------------------
# Pure-JAX reference for verification
# ---------------------------------------------------------------------------
def reference(x, wq, bq, wk, bk, wv, bv, delta):
    B, C, H, W = x.shape
    CQ = wq.shape[0]
    N = CQ * W

    def conv(w, b):
        return (jnp.einsum("oc,bchw->bohw", w, x, precision="highest")
                + b.reshape(1, CQ, 1, 1))

    q = conv(wq, bq)
    k = conv(wk, bk)
    v = conv(wv, bv)
    qm = q.transpose(0, 1, 3, 2).reshape(B, N, H)
    km = k.transpose(0, 2, 1, 3).reshape(B, H, N)
    vm = v.transpose(0, 2, 1, 3).reshape(B, H, N)
    s = jnp.einsum("bnh,bhm->bnm", qm, km, precision="highest")
    p = jax.nn.softmax(s, axis=1)
    a = jnp.einsum("bhn,bnm->bhm", vm, p, precision="highest")
    weight = a.transpose(0, 2, 1).reshape(B, CQ, H, W)
    return weight * delta + q


if __name__ == "__main__":
    B, C, H, W = 2, 4, 16, 16
    ratio = 2
    CQ = C // ratio

    key = jax.random.PRNGKey(0)
    ks = jax.random.split(key, 7)
    scale = 1.0 / np.sqrt(C)
    x = jax.random.normal(ks[0], (B, C, H, W), jnp.float32)
    wq = jax.random.normal(ks[1], (CQ, C), jnp.float32) * scale
    bq = jax.random.normal(ks[2], (CQ, 1), jnp.float32) * scale
    wk = jax.random.normal(ks[3], (CQ, C), jnp.float32) * scale
    bk = jax.random.normal(ks[4], (CQ, 1), jnp.float32) * scale
    wv = jax.random.normal(ks[5], (CQ, C), jnp.float32) * scale
    bv = jax.random.normal(ks[6], (CQ, 1), jnp.float32) * scale
    delta = jnp.float32(0.2)                                 # nn.Parameter([0.2])

    fwd = jax.jit(horizontal_attention)
    out = jax.block_until_ready(fwd(x, wq, bq, wk, bk, wv, bv, delta))

    ref = reference(x, wq, bq, wk, bk, wv, bv, 0.2)
    assert out.shape == (B, CQ, H, W)
    np.testing.assert_allclose(np.asarray(out), np.asarray(ref),
                               rtol=1e-2, atol=1e-2)

    print("KERNEL_OK")
</pallas_src>

<mosaic_0001>
module attributes {stable_mosaic.version = 11 : i64} {
  func.func @_fused_kernel(%arg0: i32, %arg1: memref<1x4x256xf32, #tpu.memory_space<vmem>>, %arg2: memref<6x4xf32, #tpu.memory_space<vmem>>, %arg3: memref<6x1xf32, #tpu.memory_space<vmem>>, %arg4: memref<1x32x16xf32, #tpu.memory_space<vmem>>, %arg5: memref<1x2x256xf32, #tpu.memory_space<vmem>>, %arg6: memref<6x256xf32, #tpu.memory_space<vmem>>, %arg7: memref<6x16x16xf32, #tpu.memory_space<vmem>>, %arg8: memref<96x16xbf16, #tpu.memory_space<vmem>>) attributes {dimension_semantics = [#tpu.dimension_semantics<parallel>], iteration_bounds = array<i64: 2>, scalar_prefetch = 0 : i64, scratch_operands = 3 : i64, tpu.core_type = #tpu.core_type<tc>, window_params = [{transform_indices = @transform_0, window_bounds = array<i64: 1, 4, 256>}, {pipeline_mode = #tpu.pipeline_mode<synchronous>, transform_indices = @transform_1, window_bounds = array<i64: 6, 4>}, {pipeline_mode = #tpu.pipeline_mode<synchronous>, transform_indices = @transform_2, window_bounds = array<i64: 6, 1>}, {transform_indices = @transform_3, window_bounds = array<i64: 1, 32, 16>}, {transform_indices = @transform_4, window_bounds = array<i64: 1, 2, 256>}]} {
    %c0 = arith.constant 0 : index
    %c0_0 = arith.constant 0 : index
    %0 = vector.load %arg2[%c0, %c0_0] : memref<6x4xf32, #tpu.memory_space<vmem>>, vector<6x4xf32>
    %c0_1 = arith.constant 0 : index
    %c0_2 = arith.constant 0 : index
    %c0_3 = arith.constant 0 : index
    %1 = vector.load %arg1[%c0_1, %c0_2, %c0_3] : memref<1x4x256xf32, #tpu.memory_space<vmem>>, vector<1x4x256xf32>
    %2 = vector.shape_cast %1 : vector<1x4x256xf32> to vector<4x256xf32>
    %cst = arith.constant dense<0.000000e+00> : vector<6x256xf32>
    %3 = tpu.matmul %0, %2, %cst {dimension_numbers = #tpu.dot_dimension_numbers<[1], [0], [0], [1], [0, 0, 1, 1], [], []>} : vector<6x4xf32>, vector<4x256xf32>, vector<6x256xf32> -> vector<6x256xf32>
    %c0_4 = arith.constant 0 : index
    %c0_5 = arith.constant 0 : index
    %4 = vector.load %arg3[%c0_4, %c0_5] : memref<6x1xf32, #tpu.memory_space<vmem>>, vector<6x1xf32>
    %5 = vector.broadcast %4 : vector<6x1xf32> to vector<6x256xf32>
    %6 = arith.addf %3, %5 : vector<6x256xf32>
    %c0_6 = arith.constant 0 : index
    %c0_7 = arith.constant 0 : index
    %7 = vector.load %arg6[%c0_6, %c0_7] : memref<6x256xf32, #tpu.memory_space<vmem>>, vector<6x256xf32>
    tpu.vector_store %arg6[%c0_6, %c0_7], %6 {strides = array<i32>} : memref<6x256xf32, #tpu.memory_space<vmem>>, vector<6x256xf32>,
    %c0_8 = arith.constant 0 : index
    %c0_9 = arith.constant 0 : index
    %8 = vector.load %arg6[%c0_8, %c0_9] : memref<6x256xf32, #tpu.memory_space<vmem>>, vector<2x256xf32>
    %c0_10 = arith.constant 0 : index
    %c0_11 = arith.constant 0 : index
    %c0_12 = arith.constant 0 : index
    %9 = vector.load %arg5[%c0_10, %c0_11, %c0_12] : memref<1x2x256xf32, #tpu.memory_space<vmem>>, vector<1x2x256xf32>
    %10 = vector.shape_cast %9 : vector<1x2x256xf32> to vector<2x256xf32>
    %11 = vector.shape_cast %8 : vector<2x256xf32> to vector<1x2x256xf32>
    tpu.vector_store %arg5[%c0_10, %c0_11, %c0_12], %11 {strides = array<i32>} : memref<1x2x256xf32, #tpu.memory_space<vmem>>, vector<1x2x256xf32>,
    %c0_13 = arith.constant 0 : index
    %c0_14 = arith.constant 0 : index
    %12 = vector.load %arg6[%c0_13, %c0_14] : memref<6x256xf32, #tpu.memory_space<vmem>>, vector<6x16xf32>
    %c0_15 = arith.constant 0 : index
    %c0_16 = arith.constant 0 : index
    %c0_17 = arith.constant 0 : index
    %13 = vector.load %arg7[%c0_15, %c0_16, %c0_17] : memref<6x16x16xf32, #tpu.memory_space<vmem>>, vector<6x1x16xf32>
    %14 = vector.shape_cast %13 : vector<6x1x16xf32> to vector<6x16xf32>
    %15 = vector.shape_cast %12 : vector<6x16xf32> to vector<6x1x16xf32>
    tpu.vector_store %arg7[%c0_15, %c0_16, %c0_17], %15 {strides = array<i32>} : memref<6x16x16xf32, #tpu.memory_space<vmem>>, vector<6x1x16xf32>,
    %c0_18 = arith.constant 0 : index
    %c16 = arith.constant 16 : index
    %16 = vector.load %arg6[%c0_18, %c16] : memref<6x256xf32, #tpu.memory_space<vmem>>, vector<6x16xf32>
    %c0_19 = arith.constant 0 : index
    %c1 = arith.constant 1 : index
    %c0_20 = arith.constant 0 : index
    %17 = vector.load %arg7[%c0_19, %c1, %c0_20] : memref<6x16x16xf32, #tpu.memory_space<vmem>>, vector<6x1x16xf32>
    %18 = vector.shape_cast %17 : vector<6x1x16xf32> to vector<6x16xf32>
    %19 = vector.shape_cast %16 : vector<6x16xf32> to vector<6x1x16xf32>
    tpu.vector_store %arg7[%c0_19, %c1, %c0_20], %19 {strides = array<i32>} : memref<6x16x16xf32, #tpu.memory_space<vmem>>, vector<6x1x16xf32>,
    %c0_21 = arith.constant 0 : index
    %c32 = arith.constant 32 : index
    %20 = vector.load %arg6[%c0_21, %c32] : memref<6x256xf32, #tpu.memory_space<vmem>>, vector<6x16xf32>
    %c0_22 = arith.constant 0 : index
    %c2 = arith.constant 2 : index
    %c0_23 = arith.constant 0 : index
    %21 = vector.load %arg7[%c0_22, %c2, %c0_23] : memref<6x16x16xf32, #tpu.memory_space<vmem>>, vector<6x1x16xf32>
    %22 = vector.shape_cast %21 : vector<6x1x16xf32> to vector<6x16xf32>
    %23 = vector.shape_cast %20 : vector<6x16xf32> to vector<6x1x16xf32>
    tpu.vector_store %arg7[%c0_22, %c2, %c0_23], %23 {strides = array<i32>} : memref<6x16x16xf32, #tpu.memory_space<vmem>>, vector<6x1x16xf32>,
    %c0_24 = arith.constant 0 : index
    %c48 = arith.constant 48 : index
    %24 = vector.load %arg6[%c0_24, %c48] : memref<6x256xf32, #tpu.memory_space<vmem>>, vector<6x16xf32>
    %c0_25 = arith.constant 0 : index
    %c3 = arith.constant 3 : index
    %c0_26 = arith.constant 0 : index
    %25 = vector.load %arg7[%c0_25, %c3, %c0_26] : memref<6x16x16xf32, #tpu.memory_space<vmem>>, vector<6x1x16xf32>
    %26 = vector.shape_cast %25 : vector<6x1x16xf32> to vector<6x16xf32>
    %27 = vector.shape_cast %24 : vector<6x16xf32> to vector<6x1x16xf32>
    tpu.vector_store %arg7[%c0_25, %c3, %c0_26], %27 {strides = array<i32>} : memref<6x16x16xf32, #tpu.memory_space<vmem>>, vector<6x1x16xf32>,
    %c0_27 = arith.constant 0 : index
    %c64 = arith.constant 64 : index
    %28 = vector.load %arg6[%c0_27, %c64] : memref<6x256xf32, #tpu.memory_space<vmem>>, vector<6x16xf32>
    %c0_28 = arith.constant 0 : index
    %c4 = arith.constant 4 : index
    %c0_29 = arith.constant 0 : index
    %29 = vector.load %arg7[%c0_28, %c4, %c0_29] : memref<6x16x16xf32, #tpu.memory_space<vmem>>, vector<6x1x16xf32>
    %30 = vector.shape_cast %29 : vector<6x1x16xf32> to vector<6x16xf32>
    %31 = vector.shape_cast %28 : vector<6x16xf32> to vector<6x1x16xf32>
    tpu.vector_store %arg7[%c0_28, %c4, %c0_29], %31 {strides = array<i32>} : memref<6x16x16xf32, #tpu.memory_space<vmem>>, vector<6x1x16xf32>,
    %c0_30 = arith.constant 0 : index
    %c80 = arith.constant 80 : index
    %32 = vector.load %arg6[%c0_30, %c80] : memref<6x256xf32, #tpu.memory_space<vmem>>, vector<6x16xf32>
    %c0_31 = arith.constant 0 : index
    %c5 = arith.constant 5 : index
    %c0_32 = arith.constant 0 : index
    %33 = vector.load %arg7[%c0_31, %c5, %c0_32] : memref<6x16x16xf32, #tpu.memory_space<vmem>>, vector<6x1x16xf32>
    %34 = vector.shape_cast %33 : vector<6x1x16xf32> to vector<6x16xf32>
    %35 = vector.shape_cast %32 : vector<6x16xf32> to vector<6x1x16xf32>
    tpu.vector_store %arg7[%c0_31, %c5, %c0_32], %35 {strides = array<i32>} : memref<6x16x16xf32, #tpu.memory_space<vmem>>, vector<6x1x16xf32>,
    %c0_33 = arith.constant 0 : index
    %c96 = arith.constant 96 : index
    %36 = vector.load %arg6[%c0_33, %c96] : memref<6x256xf32, #tpu.memory_space<vmem>>, vector<6x16xf32>
    %c0_34 = arith.constant 0 : index
    %c6 = arith.constant 6 : index
    %c0_35 = arith.constant 0 : index
    %37 = vector.load %arg7[%c0_34, %c6, %c0_35] : memref<6x16x16xf32, #tpu.memory_space<vmem>>, vector<6x1x16xf32>
    %38 = vector.shape_cast %37 : vector<6x1x16xf32> to vector<6x16xf32>
    %39 = vector.shape_cast %36 : vector<6x16xf32> to vector<6x1x16xf32>
    tpu.vector_store %arg7[%c0_34, %c6, %c0_35], %39 {strides = array<i32>} : memref<6x16x16xf32, #tpu.memory_space<vmem>>, vector<6x1x16xf32>,
    %c0_36 = arith.constant 0 : index
    %c112 = arith.constant 112 : index
    %40 = vector.load %arg6[%c0_36, %c112] : memref<6x256xf32, #tpu.memory_space<vmem>>, vector<6x16xf32>
    %c0_37 = arith.constant 0 : index
    %c7 = arith.constant 7 : index
    %c0_38 = arith.constant 0 : index
    %41 = vector.load %arg7[%c0_37, %c7, %c0_38] : memref<6x16x16xf32, #tpu.memory_space<vmem>>, vector<6x1x16xf32>
    %42 = vector.shape_cast %41 : vector<6x1x16xf32> to vector<6x16xf32>
    %43 = vector.shape_cast %40 : vector<6x16xf32> to vector<6x1x16xf32>
    tpu.vector_store %arg7[%c0_37, %c7, %c0_38], %43 {strides = array<i32>} : memref<6x16x16xf32, #tpu.memory_space<vmem>>, vector<6x1x16xf32>,
    %c0_39 = arith.constant 0 : index
    %c128 = arith.constant 128 : index
    %44 = vector.load %arg6[%c0_39, %c128] : memref<6x256xf32, #tpu.memory_space<vmem>>, vector<6x16xf32>
    %c0_40 = arith.constant 0 : index
    %c8 = arith.constant 8 : index
    %c0_41 = arith.constant 0 : index
    %45 = vector.load %arg7[%c0_40, %c8, %c0_41] : memref<6x16x16xf32, #tpu.memory_space<vmem>>, vector<6x1x16xf32>
    %46 = vector.shape_cast %45 : vector<6x1x16xf32> to vector<6x16xf32>
    %47 = vector.shape_cast %44 : vector<6x16xf32> to vector<6x1x16xf32>
    tpu.vector_store %arg7[%c0_40, %c8, %c0_41], %47 {strides = array<i32>} : memref<6x16x16xf32, #tpu.memory_space<vmem>>, vector<6x1x16xf32>,
    %c0_42 = arith.constant 0 : index
    %c144 = arith.constant 144 : index
    %48 = vector.load %arg6[%c0_42, %c144] : memref<6x256xf32, #tpu.memory_space<vmem>>, vector<6x16xf32>
    %c0_43 = arith.constant 0 : index
    %c9 = arith.constant 9 : index
    %c0_44 = arith.constant 0 : index
    %49 = vector.load %arg7[%c0_43, %c9, %c0_44] : memref<6x16x16xf32, #tpu.memory_space<vmem>>, vector<6x1x16xf32>
    %50 = vector.shape_cast %49 : vector<6x1x16xf32> to vector<6x16xf32>
    %51 = vector.shape_cast %48 : vector<6x16xf32> to vector<6x1x16xf32>
    tpu.vector_store %arg7[%c0_43, %c9, %c0_44], %51 {strides = array<i32>} : memref<6x16x16xf32, #tpu.memory_space<vmem>>, vector<6x1x16xf32>,
    %c0_45 = arith.constant 0 : index
    %c160 = arith.constant 160 : index
    %52 = vector.load %arg6[%c0_45, %c160] : memref<6x256xf32, #tpu.memory_space<vmem>>, vector<6x16xf32>
    %c0_46 = arith.constant 0 : index
    %c10 = arith.constant 10 : index
    %c0_47 = arith.constant 0 : index
    %53 = vector.load %arg7[%c0_46, %c10, %c0_47] : memref<6x16x16xf32, #tpu.memory_space<vmem>>, vector<6x1x16xf32>
    %54 = vector.shape_cast %53 : vector<6x1x16xf32> to vector<6x16xf32>
    %55 = vector.shape_cast %52 : vector<6x16xf32> to vector<6x1x16xf32>
    tpu.vector_store %arg7[%c0_46, %c10, %c0_47], %55 {strides = array<i32>} : memref<6x16x16xf32, #tpu.memory_space<vmem>>, vector<6x1x16xf32>,
    %c0_48 = arith.constant 0 : index
    %c176 = arith.constant 176 : index
    %56 = vector.load %arg6[%c0_48, %c176] : memref<6x256xf32, #tpu.memory_space<vmem>>, vector<6x16xf32>
    %c0_49 = arith.constant 0 : index
    %c11 = arith.constant 11 : index
    %c0_50 = arith.constant 0 : index
    %57 = vector.load %arg7[%c0_49, %c11, %c0_50] : memref<6x16x16xf32, #tpu.memory_space<vmem>>, vector<6x1x16xf32>
    %58 = vector.shape_cast %57 : vector<6x1x16xf32> to vector<6x16xf32>
    %59 = vector.shape_cast %56 : vector<6x16xf32> to vector<6x1x16xf32>
    tpu.vector_store %arg7[%c0_49, %c11, %c0_50], %59 {strides = array<i32>} : memref<6x16x16xf32, #tpu.memory_space<vmem>>, vector<6x1x16xf32>,
    %c0_51 = arith.constant 0 : index
    %c192 = arith.constant 192 : index
    %60 = vector.load %arg6[%c0_51, %c192] : memref<6x256xf32, #tpu.memory_space<vmem>>, vector<6x16xf32>
    %c0_52 = arith.constant 0 : index
    %c12 = arith.constant 12 : index
    %c0_53 = arith.constant 0 : index
    %61 = vector.load %arg7[%c0_52, %c12, %c0_53] : memref<6x16x16xf32, #tpu.memory_space<vmem>>, vector<6x1x16xf32>
    %62 = vector.shape_cast %61 : vector<6x1x16xf32> to vector<6x16xf32>
    %63 = vector.shape_cast %60 : vector<6x16xf32> to vector<6x1x16xf32>
    tpu.vector_store %arg7[%c0_52, %c12, %c0_53], %63 {strides = array<i32>} : memref<6x16x16xf32, #tpu.memory_space<vmem>>, vector<6x1x16xf32>,
    %c0_54 = arith.constant 0 : index
    %c208 = arith.constant 208 : index
    %64 = vector.load %arg6[%c0_54, %c208] : memref<6x256xf32, #tpu.memory_space<vmem>>, vector<6x16xf32>
    %c0_55 = arith.constant 0 : index
    %c13 = arith.constant 13 : index
    %c0_56 = arith.constant 0 : index
    %65 = vector.load %arg7[%c0_55, %c13, %c0_56] : memref<6x16x16xf32, #tpu.memory_space<vmem>>, vector<6x1x16xf32>
    %66 = vector.shape_cast %65 : vector<6x1x16xf32> to vector<6x16xf32>
    %67 = vector.shape_cast %64 : vector<6x16xf32> to vector<6x1x16xf32>
    tpu.vector_store %arg7[%c0_55, %c13, %c0_56], %67 {strides = array<i32>} : memref<6x16x16xf32, #tpu.memory_space<vmem>>, vector<6x1x16xf32>,
    %c0_57 = arith.constant 0 : index
    %c224 = arith.constant 224 : index
    %68 = vector.load %arg6[%c0_57, %c224] : memref<6x256xf32, #tpu.memory_space<vmem>>, vector<6x16xf32>
    %c0_58 = arith.constant 0 : index
    %c14 = arith.constant 14 : index
    %c0_59 = arith.constant 0 : index
    %69 = vector.load %arg7[%c0_58, %c14, %c0_59] : memref<6x16x16xf32, #tpu.memory_space<vmem>>, vector<6x1x16xf32>
    %70 = vector.shape_cast %69 : vector<6x1x16xf32> to vector<6x16xf32>
    %71 = vector.shape_cast %68 : vector<6x16xf32> to vector<6x1x16xf32>
    tpu.vector_store %arg7[%c0_58, %c14, %c0_59], %71 {strides = array<i32>} : memref<6x16x16xf32, #tpu.memory_space<vmem>>, vector<6x1x16xf32>,
    %c0_60 = arith.constant 0 : index
    %c240 = arith.constant 240 : index
    %72 = vector.load %arg6[%c0_60, %c240] : memref<6x256xf32, #tpu.memory_space<vmem>>, vector<6x16xf32>
    %c0_61 = arith.constant 0 : index
    %c15 = arith.constant 15 : index
    %c0_62 = arith.constant 0 : index
    %73 = vector.load %arg7[%c0_61, %c15, %c0_62] : memref<6x16x16xf32, #tpu.memory_space<vmem>>, vector<6x1x16xf32>
    %74 = vector.shape_cast %73 : vector<6x1x16xf32> to vector<6x16xf32>
    %75 = vector.shape_cast %72 : vector<6x16xf32> to vector<6x1x16xf32>
    tpu.vector_store %arg7[%c0_61, %c15, %c0_62], %75 {strides = array<i32>} : memref<6x16x16xf32, #tpu.memory_space<vmem>>, vector<6x1x16xf32>,
    %c0_63 = arith.constant 0 : index
    %c0_64 = arith.constant 0 : index
    %c0_65 = arith.constant 0 : index
    %76 = vector.load %arg7[%c0_63, %c0_64, %c0_65] : memref<6x16x16xf32, #tpu.memory_space<vmem>>, vector<1x16x16xf32>
    %77 = vector.shape_cast %76 : vector<1x16x16xf32> to vector<16x16xf32>
    %78 = tpu.transpose %77, [1, 0] : vector<16x16xf32> -> vector<16x16xf32>
    %79 = arith.truncf %78 : vector<16x16xf32> to vector<16x16xbf16>
    %c0_66 = arith.constant 0 : index
    %c0_67 = arith.constant 0 : index
    %80 = vector.load %arg8[%c0_66, %c0_67] : memref<96x16xbf16, #tpu.memory_space<vmem>>, vector<16x16xbf16>
    tpu.vector_store %arg8[%c0_66, %c0_67], %79 {strides = array<i32>} : memref<96x16xbf16, #tpu.memory_space<vmem>>, vector<16x16xbf16>,
    %c1_68 = arith.constant 1 : index
    %c0_69 = arith.constant 0 : index
    %c0_70 = arith.constant 0 : index
    %81 = vector.load %arg7[%c1_68, %c0_69, %c0_70] : memref<6x16x16xf32, #tpu.memory_space<vmem>>, vector<1x16x16xf32>
    %82 = vector.shape_cast %81 : vector<1x16x16xf32> to vector<16x16xf32>
    %83 = tpu.transpose %82, [1, 0] : vector<16x16xf32> -> vector<16x16xf32>
    %84 = arith.truncf %83 : vector<16x16xf32> to vector<16x16xbf16>
    %c16_71 = arith.constant 16 : index
    %c0_72 = arith.constant 0 : index
    %85 = vector.load %arg8[%c16_71, %c0_72] : memref<96x16xbf16, #tpu.memory_space<vmem>>, vector<16x16xbf16>
    tpu.vector_store %arg8[%c16_71, %c0_72], %84 {strides = array<i32>} : memref<96x16xbf16, #tpu.memory_space<vmem>>, vector<16x16xbf16>,
    %c2_73 = arith.constant 2 : index
    %c0_74 = arith.constant 0 : index
    %c0_75 = arith.constant 0 : index
    %86 = vector.load %arg7[%c2_73, %c0_74, %c0_75] : memref<6x16x16xf32, #tpu.memory_space<vmem>>, vector<1x16x16xf32>
    %87 = vector.shape_cast %86 : vector<1x16x16xf32> to vector<16x16xf32>
    %88 = tpu.transpose %87, [1, 0] : vector<16x16xf32> -> vector<16x16xf32>
    %89 = arith.truncf %88 : vector<16x16xf32> to vector<16x16xbf16>
    %c32_76 = arith.constant 32 : index
    %c0_77 = arith.constant 0 : index
    %90 = vector.load %arg8[%c32_76, %c0_77] : memref<96x16xbf16, #tpu.memory_space<vmem>>, vector<16x16xbf16>
    tpu.vector_store %arg8[%c32_76, %c0_77], %89 {strides = array<i32>} : memref<96x16xbf16, #tpu.memory_space<vmem>>, vector<16x16xbf16>,
    %c3_78 = arith.constant 3 : index
    %c0_79 = arith.constant 0 : index
    %c0_80 = arith.constant 0 : index
    %91 = vector.load %arg7[%c3_78, %c0_79, %c0_80] : memref<6x16x16xf32, #tpu.memory_space<vmem>>, vector<1x16x16xf32>
    %92 = vector.shape_cast %91 : vector<1x16x16xf32> to vector<16x16xf32>
    %93 = tpu.transpose %92, [1, 0] : vector<16x16xf32> -> vector<16x16xf32>
    %94 = arith.truncf %93 : vector<16x16xf32> to vector<16x16xbf16>
    %c48_81 = arith.constant 48 : index
    %c0_82 = arith.constant 0 : index
    %95 = vector.load %arg8[%c48_81, %c0_82] : memref<96x16xbf16, #tpu.memory_space<vmem>>, vector<16x16xbf16>
    tpu.vector_store %arg8[%c48_81, %c0_82], %94 {strides = array<i32>} : memref<96x16xbf16, #tpu.memory_space<vmem>>, vector<16x16xbf16>,
    %c4_83 = arith.constant 4 : index
    %c0_84 = arith.constant 0 : index
    %c0_85 = arith.constant 0 : index
    %96 = vector.load %arg7[%c4_83, %c0_84, %c0_85] : memref<6x16x16xf32, #tpu.memory_space<vmem>>, vector<1x16x16xf32>
    %97 = vector.shape_cast %96 : vector<1x16x16xf32> to vector<16x16xf32>
    %98 = tpu.transpose %97, [1, 0] : vector<16x16xf32> -> vector<16x16xf32>
    %99 = arith.truncf %98 : vector<16x16xf32> to vector<16x16xbf16>
    %c64_86 = arith.constant 64 : index
    %c0_87 = arith.constant 0 : index
    %100 = vector.load %arg8[%c64_86, %c0_87] : memref<96x16xbf16, #tpu.memory_space<vmem>>, vector<16x16xbf16>
    tpu.vector_store %arg8[%c64_86, %c0_87], %99 {strides = array<i32>} : memref<96x16xbf16, #tpu.memory_space<vmem>>, vector<16x16xbf16>,
    %c5_88 = arith.constant 5 : index
    %c0_89 = arith.constant 0 : index
    %c0_90 = arith.constant 0 : index
    %101 = vector.load %arg7[%c5_88, %c0_89, %c0_90] : memref<6x16x16xf32, #tpu.memory_space<vmem>>, vector<1x16x16xf32>
    %102 = vector.shape_cast %101 : vector<1x16x16xf32> to vector<16x16xf32>
    %103 = tpu.transpose %102, [1, 0] : vector<16x16xf32> -> vector<16x16xf32>
    %104 = arith.truncf %103 : vector<16x16xf32> to vector<16x16xbf16>
    %c80_91 = arith.constant 80 : index
    %c0_92 = arith.constant 0 : index
    %105 = vector.load %arg8[%c80_91, %c0_92] : memref<96x16xbf16, #tpu.memory_space<vmem>>, vector<16x16xbf16>
    tpu.vector_store %arg8[%c80_91, %c0_92], %104 {strides = array<i32>} : memref<96x16xbf16, #tpu.memory_space<vmem>>, vector<16x16xbf16>,
    %c0_93 = arith.constant 0 : index
    %c0_94 = arith.constant 0 : index
    %106 = vector.load %arg8[%c0_93, %c0_94] : memref<96x16xbf16, #tpu.memory_space<vmem>>, vector<32x16xbf16>
    %c32_95 = arith.constant 32 : index
    %c0_96 = arith.constant 0 : index
    %107 = vector.load %arg8[%c32_95, %c0_96] : memref<96x16xbf16, #tpu.memory_space<vmem>>, vector<32x16xbf16>
    %c64_97 = arith.constant 64 : index
    %c0_98 = arith.constant 0 : index
    %108 = vector.load %arg8[%c64_97, %c0_98] : memref<96x16xbf16, #tpu.memory_space<vmem>>, vector<32x16xbf16>
    %cst_99 = arith.constant dense<0.000000e+00> : vector<32x32xf32>
    %109 = tpu.matmul %107, %106, %cst_99 {dimension_numbers = #tpu.dot_dimension_numbers<[1], [1], [0], [0], [0, 0, 1, 0], [], []>} : vector<32x16xbf16>, vector<32x16xbf16>, vector<32x32xf32> -> vector<32x32xf32>
    %cst_100 = arith.constant dense<0xFF800000> : vector<32xf32>
    %110 = vector.multi_reduction <maximumf>, %109, %cst_100 [1] : vector<32x32xf32> to vector<32xf32>
    %111 = vector.shape_cast %110 : vector<32xf32> to vector<32x1xf32>
    %112 = vector.broadcast %111 : vector<32x1xf32> to vector<32x32xf32>
    %113 = arith.subf %109, %112 : vector<32x32xf32>
    %114 = math.exp %113 : vector<32x32xf32>
    %cst_101 = arith.constant dense<0.000000e+00> : vector<32xf32>
    %115 = vector.multi_reduction <add>, %114, %cst_101 [1] : vector<32x32xf32> to vector<32xf32>
    %116 = vector.shape_cast %115 : vector<32xf32> to vector<32x1xf32>
    %117 = tpu.reciprocal %116 {approx = true} : vector<32x1xf32> -> vector<32x1xf32>
    %118 = vector.broadcast %117 : vector<32x1xf32> to vector<32x32xf32>
    %119 = arith.mulf %114, %118 : vector<32x32xf32>
    %120 = arith.truncf %119 : vector<32x32xf32> to vector<32x32xbf16>
    %cst_102 = arith.constant dense<0.000000e+00> : vector<32x16xf32>
    %121 = tpu.matmul %120, %108, %cst_102 {dimension_numbers = #tpu.dot_dimension_numbers<[1], [0], [0], [1], [0, 0, 1, 1], [], []>} : vector<32x32xbf16>, vector<32x16xbf16>, vector<32x16xf32> -> vector<32x16xf32>
    %c0_103 = arith.constant 0 : index
    %c0_104 = arith.constant 0 : index
    %c0_105 = arith.constant 0 : index
    %122 = vector.load %arg4[%c0_103, %c0_104, %c0_105] : memref<1x32x16xf32, #tpu.memory_space<vmem>>, vector<1x32x16xf32>
    %123 = vector.shape_cast %122 : vector<1x32x16xf32> to vector<32x16xf32>
    %124 = vector.shape_cast %121 : vector<32x16xf32> to vector<1x32x16xf32>
    tpu.vector_store %arg4[%c0_103, %c0_104, %c0_105], %124 {strides = array<i32>} : memref<1x32x16xf32, #tpu.memory_space<vmem>>, vector<1x32x16xf32>,
    return
  }
  func.func @transform_0(%arg0: i32) -> (i32, i32, i32) {
    %c0_i32 = arith.constant 0 : i32
    %c0_i32_0 = arith.constant 0 : i32
    %c0_i32_1 = arith.constant 0 : i32
    return %arg0, %c0_i32, %c0_i32_0 : i32, i32, i32
  }
  func.func @transform_1(%arg0: i32) -> (i32, i32) {
    %c0_i32 = arith.constant 0 : i32
    %c0_i32_0 = arith.constant 0 : i32
    %c0_i32_1 = arith.constant 0 : i32
    return %c0_i32, %c0_i32_0 : i32, i32
  }
  func.func @transform_2(%arg0: i32) -> (i32, i32) {
    %c0_i32 = arith.constant 0 : i32
    %c0_i32_0 = arith.constant 0 : i32
    %c0_i32_1 = arith.constant 0 : i32
    return %c0_i32, %c0_i32_0 : i32, i32
  }
  func.func @transform_3(%arg0: i32) -> (i32, i32, i32) {
    %c0_i32 = arith.constant 0 : i32
    %c0_i32_0 = arith.constant 0 : i32
    %c0_i32_1 = arith.constant 0 : i32
    return %arg0, %c0_i32, %c0_i32_0 : i32, i32, i32
  }
  func.func @transform_4(%arg0: i32) -> (i32, i32, i32) {
    %c0_i32 = arith.constant 0 : i32
    %c0_i32_0 = arith.constant 0 : i32
    %c0_i32_1 = arith.constant 0 : i32
    return %arg0, %c0_i32, %c0_i32_0 : i32, i32, i32
  }
}

</mosaic_0001>

<bundles_post_ra>
// kernel: horizontal_attention.1
= control target key start
LH: loop header
LB: loop body
LE: loop exit
PB: predicated region body
PF: predicated region fallthrough
CT: control target
= control target key end

     0   :  { %s2564_s15 = smov 0   ;;  %s3496_s0 = inlined_call_operand.vmem [shape: f32[2,4,256], index: 0, kind: input, shape index: {}]   ;;  %s3497_s1 = inlined_call_operand.vmem [shape: f32[6,4], index: 1, kind: input, shape index: {}]   ;;  %s3498_s2 = inlined_call_operand.vmem [shape: f32[6,1], index: 2, kind: input, shape index: {}]   ;;  %s3499_s3 = inlined_call_operand.vmem [shape: f32[2,32,16], index: 3, kind: output, shape index: {0}]   ;;  %s3500_s4 = inlined_call_operand.vmem [shape: f32[2,2,256], index: 4, kind: output, shape index: {1}]  }
   0x1 LB: > { %s2369_s16 = sadd.s32 4294967295, %s2527_s15   ;;  %p2373_p0 = scmp.ge.s32.totalorder %s2527_s15, 1  ;;  %s2527_s15 = sphi %s2564_s15, %s15_s15  }
   0x2   : > { %p165_p1 = scmp.lt.s32.totalorder %s2527_s15, 3 }
   0x4   : > { %p166_p2 = pnand %p2373_p0, %p165_p1 }
   0x5   : > { %p196_p3 = scmp.lt.s32.totalorder (!%p166_p2), %s2369_s16, 1  ;;  %s2532_s29 = smov (!%p166_p2), 96  }
   0x6   : > { %169 = sbr.rel (%p166_p2) target bundleno = 1353 (0x549), region = 32  ;;  %s2533_s30 = smov (!%p166_p2), 112  }
   0x7   : > { %s2534_s5 = smov (!%p166_p2), 64   ;;  %s2535_s6 = smov (!%p166_p2), 80  }
   0x8   : > { %s2536_s7 = smov (!%p166_p2), 32   ;;  %s2537_s8 = smov (!%p166_p2), 48  }
   0x9   : > { %s2538_s9 = smov (!%p166_p2), 16  }
   0xb   : > { %v2529_v0 = vmov 0.0   ;;  %v214_v1 = vld [vmem:[%s3498_s2] sm:$0x3f]  ;;  %s3528_s16 = smov (!%p196_p3, %s2369_s16), 1  ;;  %v2530_v2 = vmov 0   ;;  %vm226_vm0 = vcmask 1043456   ;;  %v324_v9 = vlaneseq }
   0xc   : > { %295 = vmatprep.mubr.f32.mxu0 %v2529_v0  ;;  %2467 = vset.pattern.permute.xlu0 %v2530_v2  ;;  %s2408_s19 = sshll.u32 %s3528_s16, 3  ;;  %v212_v5 = vld [vmem:[%s3497_s1] sm:$0x3f]  ;;  %vm222_vm1 = vcmask 31744   ;;  %v2531_v7 = vmov 1966171168  }
   0xd   : > { %217 = vperm.xlu0 %2467, %v214_v1   ;;  %s200_s22 = scalar_lea.vmem %s3496_s0, %s2408_s19  ;;  %v322_v8 = vunpack.c.l.s4 %v2531_v7  ;;  %v325_v14 = vshrl.u32 %v324_v9, 7  ;;  %s2410_s25 = sshll.u32 %s3528_s16, 2  ;;  %vm373_vm2 = vcmask 122880   ;;  %vm1841_vm3 = vcmask 125952  }
   0xe   : > { %v213_v3 = vld [vmem:[%s200_s22] sm:$0xff]  ;;  %s210_s28 = scalar_lea.vmem %s3500_s4, %s2410_s25  ;;  %vm2101_vm4 = vcmask 130048   ;;  %vm2163_vm5 = vcmask 261120   ;;  %s2409_s10 = sshll.u32 %s3528_s16, 5 }
   0xf   : > { %v221_v4 = vcombine.high %v213_v3, %v213_v3  ;;  %v323_v13 = vunpack.c.0.s8 %v322_v8  ;;  %v2589_v18 = vsub.s32 0, %v325_v14  ;;  %s205_s13 = scalar_lea.vmem %s3499_s3, %s2409_s10 }
  0x11   : > { %2380 = vmatprep.subr.msk.mxu0 %vm226_vm0, %v221_v4  ;;  %v2584_v16 = vsub.s32 %v323_v13, %v325_v14 }
  0x12   : > { %2381 = vmatpush1.msk.msra.mxu0 %vm226_vm0, %v213_v3 }
  0x13   : > { %2382 = vmatmul.mubr.msk.f32.vlgmr.msra.gmra.mxu0 %vm222_vm1, %v212_v5 }
  0x88   : > { %v218_v6 = vpop.permute.xlu0 %217 }
  0xd3   : > { %v297_v10 = vpop.f32.mrf.mxu0 }
  0xd4   : > { %v298_v11 = vadd.f32 %v297_v10, %v218_v6 }
  0xd5   : > { %v299_v12 = vpop.f32.mrf.mxu0 }
  0xd6   : > { %302 = vst [vmem:[#allocation2] sm:$0x3f] %v298_v11  ;;  %v300_v15 = vadd.f32 %v299_v12, %v218_v6 }
  0xd8   : > { %303 = vst [vmem:[#allocation2 + $0x8] sm:$0x3f] %v300_v15 }
  0xdd   : > { %v2587_v17 = vld [vmem:[#allocation2] sm:$0x3f] }
  0xde   : > { %v486_v19 = vrot.slane %v2587_v17, %v2584_v16  ;;  %v2593_v20 = vld [vmem:[#allocation2] sm:$0x3f]  ;;  %v479_v13 = vcombine.high %v2587_v17, %v2587_v17 }
  0xdf   : > { %v2595_v21 = vld [vmem:[#allocation2] sm:$0x3f]  ;;  %v305_v23 = vld [vmem:[#allocation2 + $0x8] sm:$0x3]  ;;  %v389_v25 = vrot.slane %v2593_v20, %v2584_v16 }
  0xe0   : > { %v304_v22 = vld [vmem:[#allocation2] sm:$0x3]  ;;  %v2600_v24 = vld [vmem:[#allocation2 + $0x8] sm:$0x3f]  ;;  %v680_v26 = vrot.slane %v2595_v21, %v2584_v16  ;;  %v2611_v29 = vrot.slane %v486_v19, %v2584_v16  ;;  %v494_v55 = vcombine.high %v486_v19, %v486_v19 }
  0xe1   : > { %v308_v27 = vcombine.low %v304_v22, %v305_v23  ;;  %v2608_v28 = vrot.slane %v2600_v24, %v2584_v16  ;;  %v2614_v30 = vrot.slane %v389_v25, %v2584_v16  ;;  %v2616_v31 = vld [vmem:[#allocation2] sm:$0x3f]  ;;  %v397_v44 = vcombine.high %v389_v25, %v389_v25  ;;  %v2685_v63 = vld [vmem:[#allocation2 + $0x8] sm:$0x3f] }
  0xe2   : > { %v2618_v32 = vld [vmem:[#allocation2] sm:$0x3f]  ;;  %v529_v34 = vrot.slane %v2611_v29, %v2589_v18  ;;  %v2627_v36 = vrot.slane %v680_v26, %v2584_v16  ;;  %v583_v38 = vrot.slane %v2616_v31, %v2584_v16  ;;  %v688_v52 = vcombine.high %v680_v26, %v680_v26  ;;  %v2700_v5 = vld [vmem:[#allocation2 + $0x8] sm:$0x3f] }
  0xe3   : > { %2383 = vst.sshfl [vmem:[%s210_s28] sm:$0x33 pattern:$0x76325410] %v308_v27  ;;  %v1084_v33 = vrot.slane %v2608_v28, %v2584_v16  ;;  %v432_v35 = vrot.slane %v2614_v30, %v2589_v18  ;;  %v2629_v37 = vld [vmem:[#allocation2] sm:$0x3f]  ;;  %v874_v40 = vrot.slane %v2618_v32, %v2584_v16  ;;  %v2665_v51 = vrot.slane %v397_v44, %v2584_v16 }
  0xe4   : > { %550 = vrot.lane.b32.xlu0 %v529_v34, %s2532_s29  ;;  %v2638_v41 = vld [vmem:[#allocation2] sm:$0x3f]  ;;  %v2641_v42 = vrot.slane %v583_v38, %v2584_v16  ;;  %v777_v43 = vrot.slane %v2629_v37, %v2584_v16  ;;  %v723_v45 = vrot.slane %v2627_v36, %v2589_v18  ;;  %v2678_v58 = vrot.slane %v688_v52, %v2584_v16  ;;  %v2717_v12 = vld [vmem:[#allocation2 + $0x8] sm:$0x3f] }
  0xe5   : > { %v1106_v39 = vcombine.high %v1084_v33, %v1084_v33  ;;  %1114 = vst.msk [vmem:[#allocation3 + $0x8] sm:$0x1] %vm373_vm2, %v1084_v33  ;;  %453 = vrot.lane.b32.xlu1 %v432_v35, %s2533_s30  ;;  %v2649_v46 = vrot.slane %v874_v40, %v2584_v16  ;;  %v2658_v49 = vrot.slane %v2638_v41, %v2584_v16  ;;  %v318_v56 = vld [vmem:[#allocation2] sm:$0x3f]  ;;  %v2749_v34 = vld [vmem:[#allocation2 + $0x8] sm:$0x3f] }
  0xe6   : > { %v626_v47 = vrot.slane %v2641_v42, %v2589_v18  ;;  %v2654_v48 = vrot.slane %v777_v43, %v2584_v16  ;;  %v436_v57 = vrot.slane %v2665_v51, %v2589_v18  ;;  %v882_v59 = vcombine.high %v874_v40, %v874_v40  ;;  %v2751_v35 = vld [vmem:[#allocation2 + $0x8] sm:$0x3f] }
  0xe7   : > { %1116 = vst.msk [vmem:[#allocation3 + $0x28] sm:$0x1] %vm373_vm2, %v1106_v39  ;;  %v917_v50 = vrot.slane %v2649_v46, %v2589_v18  ;;  %v2671_v54 = vrot.slane %v2658_v49, %v2584_v16  ;;  %v2683_v61 = vrot.slane %v494_v55, %v2584_v16  ;;  %v591_v62 = vcombine.high %v583_v38, %v583_v38  ;;  %v2762_v44 = vld [vmem:[#allocation2 + $0x8] sm:$0x3f] }
  0xe8   : > { %744 = vrot.lane.b32.xlu0 %v723_v45, %s2534_s5  ;;  %v820_v53 = vrot.slane %v2654_v48, %v2589_v18  ;;  %v320_v0 = vcombine.high %v318_v56, %v318_v56  ;;  %v1061_v1 = vcombine.high %v2600_v24, %v2600_v24  ;;  %v727_v2 = vrot.slane %v2678_v58, %v2589_v18  ;;  %v2776_v52 = vld [vmem:[#allocation2 + $0x8] sm:$0x3f] }
  0xe9   : > { %647 = vrot.lane.b32.xlu1 %v626_v47, %s2535_s6  ;;  %v1014_v60 = vrot.slane %v2671_v54, %v2589_v18  ;;  %v2694_v3 = vrot.slane %v882_v59, %v2584_v16  ;;  %v2698_v4 = vrot.slane %v2685_v63, %v2584_v16  ;;  %v2703_v6 = vrot.slane %v318_v56, %v2584_v16 }
  0xea   : > { %v533_v7 = vrot.slane %v2683_v61, %v2589_v18  ;;  %v2708_v8 = vrot.slane %v591_v62, %v2584_v16  ;;  %v785_v9 = vcombine.high %v777_v43, %v777_v43  ;;  %v2711_v10 = vrot.slane %v320_v0, %v2584_v16 }
  0xeb   : > { %v2714_v11 = vrot.slane %v1061_v1, %v2584_v16  ;;  %v979_v14 = vcombine.high %v2658_v49, %v2658_v49  ;;  %v2726_v15 = vrot.slane %v2700_v5, %v2584_v16  ;;  %v921_v23 = vrot.slane %v2694_v3, %v2589_v18 }
  0xec   : > { %938 = vrot.lane.b32.xlu0 %v917_v50, %s2536_s7  ;;  %v2736_v24 = vrot.slane %v2698_v4, %v2584_v16  ;;  %v335_v25 = vcombine.high %v2703_v6, %v2703_v6  ;;  %v630_v26 = vrot.slane %v2708_v8, %v2589_v18  ;;  %v2743_v27 = vrot.slane %v785_v9, %v2584_v16 }
  0xed   : > { %841 = vrot.lane.b32.xlu1 %v820_v53, %s2537_s8  ;;  %v2747_v33 = vrot.slane %v2717_v12, %v2584_v16  ;;  %v1076_v39 = vcombine.high %v2608_v28, %v2608_v28  ;;  %v576_v43 = vcombine.high %v2616_v31, %v2616_v31  ;;  %v427_v45 = vcombine.high %v2614_v30, %v2614_v30 }
  0xee   : > { %v2770_v49 = vrot.slane %v979_v14, %v2584_v16  ;;  %v2774_v50 = vrot.slane %v2726_v15, %v2584_v16  ;;  %v770_v53 = vcombine.high %v2629_v37, %v2629_v37  ;;  %v1172_v30 = vrot.slane %v2736_v24, %v2589_v18 }
  0xef   : > { %v1517_v55 = vrot.slane %v2749_v34, %v2584_v16  ;;  %v2786_v56 = vrot.slane %v2751_v35, %v2584_v16  ;;  %v824_v59 = vrot.slane %v2743_v27, %v2589_v18  ;;  %v2798_v62 = vrot.slane %v2762_v44, %v2584_v16 }
  0xf0   : > { %455 = vrot.lane.b32.xlu0 %v436_v57, %s2533_s30  ;;  %v1018_v9 = vrot.slane %v2770_v49, %v2589_v18  ;;  %v1366_v14 = vrot.slane %v2774_v50, %v2589_v18  ;;  %v524_v38 = vcombine.high %v2611_v29, %v2611_v29  ;;  %v1331_v0 = vcombine.high %v2726_v15, %v2726_v15 }
  0xf1   : > { %1035 = vrot.lane.b32.xlu1 %v1014_v60, %s2538_s9  ;;  %v2794_v60 = vrot.slane %v2747_v33, %v2584_v16  ;;  %v2825_v40 = vrot.slane %v2786_v56, %v2584_v16  ;;  %v718_v29 = vcombine.high %v2627_v36, %v2627_v36  ;;  %v621_v47 = vcombine.high %v2641_v42, %v2641_v42 }
  0xf2   : > { %v912_v22 = vcombine.high %v2649_v46, %v2649_v46  ;;  %v2856_v15 = vrot.slane %v427_v45, %v2589_v18  ;;  %v1009_v36 = vcombine.high %v2671_v54, %v2671_v54  ;;  %v1525_v54 = vcombine.high %v1517_v55, %v1517_v55 }
  0xf3   : > { %v1269_v1 = vrot.slane %v2794_v60, %v2589_v18  ;;  %v1463_v46 = vrot.slane %v2825_v40, %v2589_v18  ;;  %v2882_v57 = vrot.slane %v621_v47, %v2589_v18  ;;  %v3502_v31 = vcombine.high %v2717_v12, %v2717_v12 }
  0xf4   : > { %746 = vrot.lane.b32.xlu0 %v727_v2, %s2534_s5 }
  0xf5   : > { %552 = vrot.lane.b32.xlu1 %v533_v7, %s2532_s29  ;;  %v2809_v7 = vrot.slane %v2776_v52, %v2584_v16 }
  0xf8   : > { %940 = vrot.lane.b32.xlu0 %v921_v23, %s2536_s7  ;;  %v2835_v23 = vrot.slane %v2798_v62, %v2584_v16 }
  0xf9   : > { %649 = vrot.lane.b32.xlu1 %v630_v26, %s2535_s6  ;;  %v1413_v26 = vcombine.high %v2751_v35, %v2751_v35  ;;  %v1137_v35 = vcombine.high %v2698_v4, %v2698_v4  ;;  %v1607_v4 = vcombine.high %v2776_v52, %v2776_v52  ;;  %v1234_v52 = vcombine.high %v2747_v33, %v2747_v33 }
  0xfa   : > { %v1754_v45 = vrot.slane %v2835_v23, %v2589_v18  ;;  %v2885_v33 = vrot.slane %v912_v22, %v2589_v18  ;;  %v343_v22 = vrot.slane %v2703_v6, %v2584_v16  ;;  %v2922_v6 = vrot.slane %v479_v13, %v2584_v16 }
  0xfb   : > { %v2872_v19 = vrot.slane %v1137_v35, %v2584_v16  ;;  %v2899_v47 = vrot.slane %v1234_v52, %v2584_v16  ;;  %v2916_v52 = vrot.slane %v1525_v54, %v2584_v16  ;;  %v590_v54 = vrot.slane %v576_v43, %v2584_v16 }
  0xfc   : > { %1193 = vrot.lane.b32.xlu0 %v1172_v30, %s2533_s30  ;;  %v2821_v30 = vrot.slane %v1517_v55, %v2584_v16  ;;  %v2892_v55 = vrot.slane %v1009_v36, %v2589_v18  ;;  %374 = vst.msk [vmem:[#allocation3] sm:$0x1] %vm373_vm2, %v343_v22  ;;  %v365_v28 = vcombine.high %v343_v22, %v343_v22 }
  0xfd   : > { %843 = vrot.lane.b32.xlu1 %v824_v59, %s2537_s8  ;;  %v2844_v59 = vrot.slane %v2809_v7, %v2584_v16  ;;  %v1176_v36 = vrot.slane %v2872_v19, %v2589_v18  ;;  %v495_v17 = vcombine.high %v2922_v6, %v2922_v6  ;;  %v2939_v13 = vrot.slane %v770_v53, %v2584_v16 }
  0xfe   : > { %v1560_v42 = vrot.slane %v2821_v30, %v2589_v18  ;;  %v2951_v43 = vrot.slane %v3502_v31, %v2584_v16  ;;  %376 = vst.msk [vmem:[#allocation3 + $0x20] sm:$0x1] %vm373_vm2, %v365_v28  ;;  %v592_v37 = vcombine.high %v590_v54, %v590_v54  ;;  %v2957_v53 = vrot.slane %v1413_v26, %v2584_v16 }
  0xff   : > { %v1657_v2 = vrot.slane %v2844_v59, %v2589_v18 }
 0x100   : > { %1387 = vrot.lane.b32.xlu0 %v1366_v14, %s2535_s6  ;;  %v815_v14 = vcombine.high %v2654_v48, %v2654_v48  ;;  %v2875_v48 = vrot.slane %v1331_v0, %v2584_v16  ;;  %v1235_v26 = vcombine.high %v2951_v43, %v2951_v43 }
 0x101   : > { %1037 = vrot.lane.b32.xlu1 %v1018_v9, %s2538_s9  ;;  %v537_v9 = vrot.slane %v524_v38, %v2589_v18  ;;  %v731_v38 = vrot.slane %v718_v29, %v2589_v18 }
 0x102   : > { %v2889_v35 = vrot.slane %v815_v14, %v2589_v18  ;;  %v1098_v14 = vrot.slane %v1076_v39, %v2584_v16  ;;  %v2994_v31 = vrot.slane %v1235_v26, %v2584_v16 }
 0x104   : > { %1581 = vrot.lane.b32.xlu0 %v1560_v42, %s2537_s8  ;;  %v1370_v42 = vrot.slane %v2875_v48, %v2589_v18  ;;  %v1107_v39 = vcombine.high %v1098_v14, %v1098_v14  ;;  %1115 = vst.msk [vmem:[#allocation3 + $0x18] sm:$0x1] %vm373_vm2, %v1098_v14  ;;  %v786_v14 = vcombine.high %v2939_v13, %v2939_v13 }
 0x105   : > { %1290 = vrot.lane.b32.xlu1 %v1269_v1, %s2532_s29  ;;  %v357_v1 = vrot.slane %v335_v25, %v2584_v16 }
 0x106   : > { %1117 = vst.msk [vmem:[#allocation3 + $0x38] sm:$0x1] %vm373_vm2, %v1107_v39 }
 0x107   : > { %375 = vst.msk [vmem:[#allocation3 + $0x10] sm:$0x1] %vm373_vm2, %v357_v1  ;;  %v366_v25 = vcombine.high %v357_v1, %v357_v1  ;;  %v2967_v1 = vrot.slane %v495_v17, %v2584_v16 }
 0x108   : > { %1775 = vrot.lane.b32.xlu0 %v1754_v45, %s2538_s9  ;;  %v3501_v45 = vcombine.high %v2638_v41, %v2638_v41  ;;  %v2960_v41 = vrot.slane %v1607_v4, %v2584_v16  ;;  %v2977_v4 = vrot.slane %v592_v37, %v2584_v16  ;;  %v606_v37 = vrot.slane %v590_v54, %v2584_v16 }
 0x109   : > { %1484 = vrot.lane.b32.xlu1 %v1463_v46, %s2534_s5  ;;  %377 = vst.msk [vmem:[#allocation3 + $0x30] sm:$0x1] %vm373_vm2, %v366_v25  ;;  %v3503_v46 = vcombine.high %v2593_v20, %v2593_v20  ;;  %v1429_v20 = vcombine.high %v2957_v53, %v2957_v53 }
 0x10a   : > { %v2945_v22 = vrot.slane %v3501_v45, %v2584_v16  ;;  %v1623_v25 = vcombine.high %v2960_v41, %v2960_v41  ;;  %v2988_v45 = vrot.slane %v786_v14, %v2584_v16  ;;  %v3504_v14 = vcombine.high %v2595_v21, %v2595_v21 }
 0x10b   : > { %v396_v12 = vrot.slane %v3503_v46, %v2584_v16  ;;  %v2999_v46 = vrot.slane %v1429_v20, %v2584_v16  ;;  %v3026_v26 = vrot.slane %v606_v37, %v2589_v18  ;;  %v3507_v21 = vcombine.high %v2700_v5, %v2700_v5 }
 0x10c   : > { %v980_v28 = vcombine.high %v2945_v22, %v2945_v22  ;;  %554 = vrot.lane.b32.xlu0 %v537_v9, %s2532_s29  ;;  %v687_v0 = vrot.slane %v3504_v14, %v2584_v16  ;;  %v3508_v20 = vcombine.high %v2749_v34, %v2749_v34  ;;  %v509_v5 = vrot.slane %v2922_v6, %v2584_v16 }
 0x10d   : > { %v412_v39 = vrot.slane %v396_v12, %v2584_v16  ;;  %1678 = vrot.lane.b32.xlu1 %v1657_v2, %s2536_s7  ;;  %v3002_v2 = vrot.slane %v1623_v25, %v2584_v16  ;;  %v1330_v14 = vrot.slane %v3507_v21, %v2584_v16 }
 0x10e   : > { %v2991_v9 = vrot.slane %v980_v28, %v2584_v16  ;;  %v689_v37 = vcombine.high %v687_v0, %v687_v0 }
 0x10f   : > { %v3005_v17 = vrot.slane %v412_v39, %v2589_v18  ;;  %v398_v39 = vcombine.high %v396_v12, %v396_v12  ;;  %v3506_v12 = vcombine.high %v2685_v63, %v2685_v63  ;;  %v1332_v29 = vcombine.high %v1330_v14, %v1330_v14 }
 0x110   : > { %748 = vrot.lane.b32.xlu0 %v731_v38, %s2534_s5  ;;  %v3505_v38 = vcombine.high %v2618_v32, %v2618_v32  ;;  %v1524_v32 = vrot.slane %v3508_v20, %v2584_v16  ;;  %v3058_v34 = vrot.slane %v689_v37, %v2584_v16  ;;  %v703_v37 = vrot.slane %v687_v0, %v2584_v16 }
 0x111   : > { %457 = vrot.lane.b32.xlu1 %v2856_v15, %s2533_s30  ;;  %v1136_v25 = vrot.slane %v3506_v12, %v2584_v16  ;;  %v3041_v15 = vrot.slane %v398_v39, %v2584_v16  ;;  %v3069_v6 = vrot.slane %v1332_v29, %v2584_v16  ;;  %v994_v29 = vrot.slane %v2945_v22, %v2584_v16 }
 0x112   : > { %v881_v54 = vrot.slane %v3505_v38, %v2584_v16  ;;  %v3509_v38 = vcombine.high %v2762_v44, %v2762_v44  ;;  %v1526_v20 = vcombine.high %v1524_v32, %v1524_v32  ;;  %v3107_v0 = vrot.slane %v703_v37, %v2589_v18 }
 0x113   : > { %v1138_v28 = vcombine.high %v1136_v25, %v1136_v25  ;;  %v1346_v22 = vrot.slane %v1330_v14, %v2584_v16 }
 0x114   : > { %v1718_v63 = vrot.slane %v3509_v38, %v2584_v16  ;;  %v883_v12 = vcombine.high %v881_v54, %v881_v54  ;;  %942 = vrot.lane.b32.xlu0 %v2885_v33, %s2536_s7  ;;  %v3072_v33 = vrot.slane %v509_v5, %v2589_v18  ;;  %v3077_v39 = vrot.slane %v1526_v20, %v2584_v16 }
 0x115   : > { %651 = vrot.lane.b32.xlu1 %v2882_v57, %s2535_s6  ;;  %v3066_v38 = vrot.slane %v1138_v28, %v2584_v16  ;;  %v1249_v20 = vrot.slane %v2951_v43, %v2584_v16  ;;  %v1152_v5 = vrot.slane %v1136_v25, %v2584_v16  ;;  %v1540_v25 = vrot.slane %v1524_v32, %v2584_v16 }
 0x116   : > { %v1720_v21 = vcombine.high %v1718_v63, %v1718_v63  ;;  %v3063_v44 = vrot.slane %v883_v12, %v2584_v16  ;;  %v800_v12 = vrot.slane %v2939_v13, %v2584_v16  ;;  %v3114_v13 = vrot.slane %v994_v29, %v2589_v18 }
 0x117   : > { %v3128_v43 = vrot.slane %v1152_v5, %v2589_v18  ;;  %v1734_v29 = vrot.slane %v1718_v63, %v2584_v16  ;;  %v3148_v32 = vrot.slane %v1540_v25, %v2589_v18  ;;  %v1564_v63 = vrot.slane %v2916_v52, %v2589_v18 }
 0x118   : > { %v3080_v57 = vrot.slane %v1720_v21, %v2584_v16  ;;  %v937_v28 = vrot.slane %v3063_v44, %v2589_v18  ;;  %1195 = vrot.lane.b32.xlu0 %v1176_v36, %s2533_s30  ;;  %v3100_v21 = vrot.slane %v800_v12, %v2589_v18  ;;  %v897_v36 = vrot.slane %v881_v54, %v2584_v16 }
 0x119   : > { %845 = vrot.lane.b32.xlu1 %v2889_v35, %s2537_s8  ;;  %v1443_v12 = vrot.slane %v2957_v53, %v2584_v16  ;;  %v1637_v35 = vrot.slane %v2960_v41, %v2584_v16  ;;  %v3125_v54 = vrot.slane %v1249_v20, %v2589_v18  ;;  %v3139_v41 = vrot.slane %v1346_v22, %v2589_v18 }
 0x11a   : > { %v3122_v37 = vrot.slane %v897_v36, %v2589_v18  ;;  %v3511_v20 = vcombine.high %v2714_v11, %v2714_v11  ;;  %v1091_v25 = vrot.slane %v2714_v11, %v2584_v16  ;;  %v3525_v44 = vrot.slane %v3077_v39, %v2589_v18 }
 0x11b   : > { %v3136_v53 = vrot.slane %v1443_v12, %v2589_v18  ;;  %v3142_v14 = vrot.slane %v1637_v35, %v2589_v18  ;;  %v350_v12 = vrot.slane %v2711_v10, %v2584_v16  ;;  %v3169_v35 = vrot.slane %v1734_v29, %v2589_v18 }
 0x11c   : > { %1389 = vrot.lane.b32.xlu0 %v1370_v42, %s2535_s6  ;;  %v3510_v42 = vcombine.high %v2711_v10, %v2711_v10  ;;  %v1105_v36 = vrot.slane %v3511_v20, %v2584_v16  ;;  %v3513_v10 = vcombine.high %v2786_v56, %v2786_v56  ;;  %1118 = vst.msk [vmem:[#allocation3 + $0x48] sm:$0x1] %vm373_vm2, %v1091_v25 }
 0x11d   : > { %1039 = vrot.lane.b32.xlu1 %v2892_v55, %s2538_s9  ;;  %v3512_v55 = vcombine.high %v2798_v62, %v2798_v62  ;;  %v1622_v62 = vcombine.high %v2809_v7, %v2809_v7  ;;  %378 = vst.msk [vmem:[#allocation3 + $0x40] sm:$0x1] %vm373_vm2, %v350_v12  ;;  %v428_v56 = vcombine.high %v2665_v51, %v2665_v51 }
 0x11e   : > { %v364_v5 = vrot.slane %v3510_v42, %v2584_v16  ;;  %v1273_v42 = vrot.slane %v2899_v47, %v2589_v18  ;;  %v3179_v20 = vrot.slane %v3513_v10, %v2584_v16  ;;  %1119 = vst.msk [vmem:[#allocation3 + $0x58] sm:$0x1] %vm373_vm2, %v1105_v36  ;;  %v622_v36 = vcombine.high %v2708_v8, %v2708_v8 }
 0x11f   : > { %v3166_v22 = vrot.slane %v3512_v55, %v2584_v16  ;;  %v3196_v29 = vrot.slane %v1622_v62, %v2584_v16  ;;  %v525_v51 = vcombine.high %v2683_v61, %v2683_v61  ;;  %v719_v8 = vcombine.high %v2678_v58, %v2678_v58 }
 0x120   : > { %379 = vst.msk [vmem:[#allocation3 + $0x50] sm:$0x1] %vm373_vm2, %v364_v5  ;;  %1583 = vrot.lane.b32.xlu0 %v1564_v63, %s2537_s8  ;;  %v1467_v7 = vrot.slane %v3179_v20, %v2589_v18  ;;  %v444_v5 = vrot.slane %v428_v56, %v2589_v18  ;;  %v638_v16 = vrot.slane %v622_v36, %v2589_v18 }
 0x121   : > { %1292 = vrot.lane.b32.xlu1 %v1273_v42, %s2532_s29  ;;  %v1758_v11 = vrot.slane %v3166_v22, %v2589_v18  ;;  %v1661_v12 = vrot.slane %v3196_v29, %v2589_v18  ;;  %v816_v63 = vcombine.high %v2743_v27, %v2743_v27  ;;  %v541_v55 = vrot.slane %v525_v51, %v2589_v18 }
 0x122   : > { %v1010_v25 = vcombine.high %v2770_v49, %v2770_v49  ;;  %v735_v42 = vrot.slane %v719_v8, %v2589_v18  ;;  %v913_v10 = vcombine.high %v2694_v3, %v2694_v3  ;;  %v1264_v27 = vcombine.high %v2794_v60, %v2794_v60 }
 0x123   : > { %v832_v61 = vrot.slane %v816_v63, %v2589_v18  ;;  %v1458_v49 = vcombine.high %v2825_v40, %v2825_v40  ;;  %v1652_v60 = vcombine.high %v2844_v59, %v2844_v59  ;;  %v1555_v36 = vcombine.high %v2821_v30, %v2821_v30 }
 0x124   : > { %1777 = vrot.lane.b32.xlu0 %v1758_v11, %s2538_s9  ;;  %v1026_v58 = vrot.slane %v1010_v25, %v2589_v18  ;;  %v929_v62 = vrot.slane %v913_v10, %v2589_v18  ;;  %v1167_v11 = vcombine.high %v2736_v24, %v2736_v24  ;;  %v1277_v3 = vrot.slane %v1264_v27, %v2589_v18 }
 0x125   : > { %1486 = vrot.lane.b32.xlu1 %v1467_v7, %s2534_s5  ;;  %v1361_v7 = vcombine.high %v2774_v50, %v2774_v50  ;;  %v1471_v24 = vrot.slane %v1458_v49, %v2589_v18  ;;  %v1665_v40 = vrot.slane %v1652_v60, %v2589_v18  ;;  %v1168_v50 = vcombine.high %v2872_v19, %v2872_v19 }
 0x126   : > { %v1180_v56 = vrot.slane %v1167_v11, %v2589_v18  ;;  %v1749_v51 = vcombine.high %v2835_v23, %v2835_v23  ;;  %v1362_v59 = vcombine.high %v2875_v48, %v2875_v48  ;;  %v1265_v63 = vcombine.high %v2899_v47, %v2899_v47 }
 0x127   : > { %v1184_v30 = vrot.slane %v1168_v50, %v2589_v18  ;;  %v1556_v23 = vcombine.high %v2916_v52, %v2916_v52  ;;  %v1459_v8 = vcombine.high %v3179_v20, %v3179_v20  ;;  %v1750_v47 = vcombine.high %v3166_v22, %v3166_v22 }
 0x128   : > { %459 = vrot.lane.b32.xlu0 %v444_v5, %s2533_s30  ;;  %v1374_v5 = vrot.slane %v1361_v7, %v2589_v18  ;;  %v1378_v19 = vrot.slane %v1362_v59, %v2589_v18  ;;  %v1653_v25 = vcombine.high %v3196_v29, %v3196_v29 }
 0x129   : > { %1680 = vrot.lane.b32.xlu1 %v1661_v12, %s2536_s7  ;;  %v1568_v12 = vrot.slane %v1555_v36, %v2589_v18  ;;  %v1572_v48 = vrot.slane %v1556_v23, %v2589_v18  ;;  %v1766_v52 = vrot.slane %v1750_v47, %v2589_v18 }
 0x12a   : > { %v1669_v20 = vrot.slane %v1653_v25, %v2589_v18 }
 0x12c   : > { %653 = vrot.lane.b32.xlu0 %v638_v16, %s2535_s6  ;;  %v1762_v16 = vrot.slane %v1749_v51, %v2589_v18 }
 0x12d   : > { %556 = vrot.lane.b32.xlu1 %v541_v55, %s2532_s29  ;;  %v1281_v55 = vrot.slane %v1265_v63, %v2589_v18 }
 0x130   : > { %847 = vrot.lane.b32.xlu0 %v832_v61, %s2537_s8  ;;  %v1475_v61 = vrot.slane %v1459_v8, %v2589_v18 }
 0x131   : > { %750 = vrot.lane.b32.xlu1 %v735_v42, %s2534_s5 }
 0x134   : > { %1041 = vrot.lane.b32.xlu0 %v1026_v58, %s2538_s9 }
 0x135   : > { %944 = vrot.lane.b32.xlu1 %v929_v62, %s2536_s7 }
 0x138   : > { %1294 = vrot.lane.b32.xlu0 %v1277_v3, %s2532_s29 }
 0x139   : > { %1197 = vrot.lane.b32.xlu1 %v1180_v56, %s2533_s30 }
 0x13c   : > { %1488 = vrot.lane.b32.xlu0 %v1471_v24, %s2534_s5 }
 0x13d   : > { %1391 = vrot.lane.b32.xlu1 %v1374_v5, %s2535_s6 }
 0x140   : > { %1682 = vrot.lane.b32.xlu0 %v1665_v40, %s2536_s7 }
 0x141   : > { %1585 = vrot.lane.b32.xlu1 %v1568_v12, %s2537_s8 }
 0x144   : > { %1199 = vrot.lane.b32.xlu0 %v1184_v30, %s2533_s30 }
 0x145   : > { %1779 = vrot.lane.b32.xlu1 %v1762_v16, %s2538_s9 }
 0x148   : > { %1393 = vrot.lane.b32.xlu0 %v1378_v19, %s2535_s6 }
 0x149   : > { %1296 = vrot.lane.b32.xlu1 %v1281_v55, %s2532_s29 }
 0x14c   : > { %1587 = vrot.lane.b32.xlu0 %v1572_v48, %s2537_s8 }
 0x14d   : > { %1490 = vrot.lane.b32.xlu1 %v1475_v61, %s2534_s5 }
 0x150   : > { %1781 = vrot.lane.b32.xlu0 %v1766_v52, %s2538_s9 }
 0x151   : > { %1684 = vrot.lane.b32.xlu1 %v1669_v20, %s2536_s7 }
 0x156   : > { %v551_v42 = vpop.permute.xlu0 %550 }
 0x157   : > { %v454_v10 = vpop.permute.xlu1 %453  ;;  %568 = vst.msk [vmem:[#allocation3 + $0x2] sm:$0x1] %vm373_vm2, %v551_v42 }
 0x158   : > { %471 = vst.msk [vmem:[#allocation3 + $0x1] sm:$0x1] %vm373_vm2, %v454_v10 }
 0x15a   : > { %v745_v22 = vpop.permute.xlu0 %744 }
 0x15b   : > { %762 = vst.msk [vmem:[#allocation3 + $0x4] sm:$0x1] %vm373_vm2, %v745_v22  ;;  %v648_v29 = vpop.permute.xlu1 %647 }
 0x15c   : > { %665 = vst.msk [vmem:[#allocation3 + $0x3] sm:$0x1] %vm373_vm2, %v648_v29 }
 0x15e   : > { %v939_v58 = vpop.permute.xlu0 %938 }
 0x15f   : > { %956 = vst.msk [vmem:[#allocation3 + $0x6] sm:$0x1] %vm373_vm2, %v939_v58  ;;  %v842_v27 = vpop.permute.xlu1 %841 }
 0x160   : > { %859 = vst.msk [vmem:[#allocation3 + $0x5] sm:$0x1] %vm373_vm2, %v842_v27 }
 0x162   : > { %v456_v62 = vpop.permute.xlu0 %455 }
 0x163   : > { %v1036_v11 = vpop.permute.xlu1 %1035  ;;  %472 = vst.msk [vmem:[#allocation3 + $0x11] sm:$0x1] %vm373_vm2, %v456_v62 }
 0x164   : > { %1053 = vst.msk [vmem:[#allocation3 + $0x7] sm:$0x1] %vm373_vm2, %v1036_v11 }
 0x166   : > { %v747_v3 = vpop.permute.xlu0 %746 }
 0x167   : > { %v553_v49 = vpop.permute.xlu1 %552  ;;  %763 = vst.msk [vmem:[#allocation3 + $0x14] sm:$0x1] %vm373_vm2, %v747_v3 }
 0x168   : > { %569 = vst.msk [vmem:[#allocation3 + $0x12] sm:$0x1] %vm373_vm2, %v553_v49 }
 0x16a   : > { %v941_v56 = vpop.permute.xlu0 %940 }
 0x16b   : > { %v650_v7 = vpop.permute.xlu1 %649  ;;  %957 = vst.msk [vmem:[#allocation3 + $0x16] sm:$0x1] %vm373_vm2, %v941_v56  ;;  %v1799_v24 = vld [vmem:[#allocation3] sm:$0xff] }
 0x16c   : > { %666 = vst.msk [vmem:[#allocation3 + $0x13] sm:$0x1] %vm373_vm2, %v650_v7 }
 0x16e   : > { %v1194_v60 = vpop.permute.xlu0 %1193  ;;  %1801 = vxpose.xlu0.b32.start [1/2] (short) (narrow) %v1799_v24, 16 }
 0x16f   : > { %v844_v5 = vpop.permute.xlu1 %843  ;;  %1211 = vst.msk [vmem:[#allocation3 + $0x9] sm:$0x1] %vm373_vm2, %v1194_v60 }
 0x170   : > { %860 = vst.msk [vmem:[#allocation3 + $0x15] sm:$0x1] %vm373_vm2, %v844_v5 }
 0x172   : > { %v1388_v36 = vpop.permute.xlu0 %1387 }
 0x173   : > { %v1038_v40 = vpop.permute.xlu1 %1037  ;;  %1405 = vst.msk [vmem:[#allocation3 + $0xb] sm:$0x1] %vm373_vm2, %v1388_v36 }
 0x174   : > { %1054 = vst.msk [vmem:[#allocation3 + $0x17] sm:$0x1] %vm373_vm2, %v1038_v40 }
 0x176   : > { %v1582_v50 = vpop.permute.xlu0 %1581 }
 0x177   : > { %v1291_v12 = vpop.permute.xlu1 %1290  ;;  %1599 = vst.msk [vmem:[#allocation3 + $0xd] sm:$0x1] %vm373_vm2, %v1582_v50 }
 0x178   : > { %1308 = vst.msk [vmem:[#allocation3 + $0xa] sm:$0x1] %vm373_vm2, %v1291_v12 }
 0x17a   : > { %v1776_v51 = vpop.permute.xlu0 %1775 }
 0x17b   : > { %v1485_v30 = vpop.permute.xlu1 %1484  ;;  %1793 = vst.msk [vmem:[#allocation3 + $0xf] sm:$0x1] %vm373_vm2, %v1776_v51  ;;  %v1845_v59 = vld [vmem:[#allocation3 + $0x10] sm:$0xff] }
 0x17c   : > { %1502 = vst.msk [vmem:[#allocation3 + $0xc] sm:$0x1] %vm373_vm2, %v1485_v30  ;;  %1847 = vxpose.xlu1.b32.start [1/2] (short) (narrow) %v1845_v59, 16 }
 0x17e   : > { %v555_v16 = vpop.permute.xlu0 %554 }
 0x17f   : > { %v1679_v63 = vpop.permute.xlu1 %1678  ;;  %570 = vst.msk [vmem:[#allocation3 + $0x22] sm:$0x1] %vm373_vm2, %v555_v16 }
 0x180   : > { %1696 = vst.msk [vmem:[#allocation3 + $0xe] sm:$0x1] %vm373_vm2, %v1679_v63 }
 0x182   : > { %v749_v19 = vpop.permute.xlu0 %748 }
 0x183   : > { %v458_v23 = vpop.permute.xlu1 %457  ;;  %764 = vst.msk [vmem:[#allocation3 + $0x24] sm:$0x1] %vm373_vm2, %v749_v19 }
 0x184   : > { %473 = vst.msk [vmem:[#allocation3 + $0x21] sm:$0x1] %vm373_vm2, %v458_v23 }
 0x186   : > { %v943_v55 = vpop.permute.xlu0 %942 }
 0x187   : > { %v652_v8 = vpop.permute.xlu1 %651  ;;  %958 = vst.msk [vmem:[#allocation3 + $0x26] sm:$0x1] %vm373_vm2, %v943_v55  ;;  %v1800_v48 = vld [vmem:[#allocation3 + $0x8] sm:$0xff] }
 0x188   : > { %667 = vst.msk [vmem:[#allocation3 + $0x23] sm:$0x1] %vm373_vm2, %v652_v8  ;;  %1802 = vxpose.xlu0.b32.end [2/2] (short) (narrow) %v1800_v48, 16  ;;  %v3514_v8 = vrot.slane %v2967_v1, %v2589_v18 }
 0x18a   : > { %v1196_v47 = vpop.permute.xlu0 %1195 }
 0x18b   : > { %v846_v61 = vpop.permute.xlu1 %845  ;;  %1212 = vst.msk [vmem:[#allocation3 + $0x19] sm:$0x1] %vm373_vm2, %v1196_v47 }
 0x18c   : > { %861 = vst.msk [vmem:[#allocation3 + $0x25] sm:$0x1] %vm373_vm2, %v846_v61  ;;  %v3515_v61 = vrot.slane %v2977_v4, %v2589_v18  ;;  %v3519_v4 = vrot.slane %v2999_v46, %v2589_v18 }
 0x18e   : > { %v1390_v25 = vpop.permute.xlu0 %1389 }
 0x18f   : > { %v1040_v52 = vpop.permute.xlu1 %1039  ;;  %1406 = vst.msk [vmem:[#allocation3 + $0x1b] sm:$0x1] %vm373_vm2, %v1390_v25  ;;  %v3516_v25 = vrot.slane %v2988_v45, %v2589_v18  ;;  %v3520_v45 = vrot.slane %v3002_v2, %v2589_v18  ;;  %v3523_v2 = vrot.slane %v3066_v38, %v2589_v18  ;;  %v3526_v38 = vrot.slane %v3080_v57, %v2589_v18 }
 0x190   : > { %1055 = vst.msk [vmem:[#allocation3 + $0x27] sm:$0x1] %vm373_vm2, %v1040_v52 }
 0x192   : > { %v1584_v20 = vpop.permute.xlu0 %1583 }
 0x193   : > { %v1293_v42 = vpop.permute.xlu1 %1292  ;;  %1600 = vst.msk [vmem:[#allocation3 + $0x1d] sm:$0x1] %vm373_vm2, %v1584_v20 }
 0x194   : > { %1309 = vst.msk [vmem:[#allocation3 + $0x1a] sm:$0x1] %vm373_vm2, %v1293_v42  ;;  %v3517_v42 = vrot.slane %v2991_v9, %v2589_v18  ;;  %v3521_v9 = vrot.slane %v3041_v15, %v2589_v18 }
 0x196   : > { %v1778_v10 = vpop.permute.xlu0 %1777 }
 0x197   : > { %v1487_v22 = vpop.permute.xlu1 %1486  ;;  %1794 = vst.msk [vmem:[#allocation3 + $0x1f] sm:$0x1] %vm373_vm2, %v1778_v10  ;;  %v1890_v40 = vld [vmem:[#allocation3 + $0x20] sm:$0xff]  ;;  %v3518_v10 = vrot.slane %v2994_v31, %v2589_v18  ;;  %v3522_v31 = vrot.slane %v3058_v34, %v2589_v18  ;;  %v3524_v34 = vrot.slane %v3069_v6, %v2589_v18 }
 0x198   : > { %1503 = vst.msk [vmem:[#allocation3 + $0x1c] sm:$0x1] %vm373_vm2, %v1487_v22 }
 0x19a   : > { %v460_v29 = vpop.permute.xlu0 %459 }
 0x19b   : > { %v1681_v58 = vpop.permute.xlu1 %1680  ;;  %474 = vst.msk [vmem:[#allocation3 + $0x31] sm:$0x1] %vm373_vm2, %v460_v29 }
 0x19c   : > { %1697 = vst.msk [vmem:[#allocation3 + $0x1e] sm:$0x1] %vm373_vm2, %v1681_v58 }
 0x19e   : > { %v654_v27 = vpop.permute.xlu0 %653 }
 0x19f   : > { %v557_v62 = vpop.permute.xlu1 %556  ;;  %668 = vst.msk [vmem:[#allocation3 + $0x33] sm:$0x1] %vm373_vm2, %v654_v27 }
 0x1a0   : > { %571 = vst.msk [vmem:[#allocation3 + $0x32] sm:$0x1] %vm373_vm2, %v557_v62 }
 0x1a2   : > { %v848_v11 = vpop.permute.xlu0 %847 }
 0x1a3   : > { %v751_v3 = vpop.permute.xlu1 %750  ;;  %862 = vst.msk [vmem:[#allocation3 + $0x35] sm:$0x1] %vm373_vm2, %v848_v11  ;;  %v1846_v49 = vld [vmem:[#allocation3 + $0x18] sm:$0xff] }
 0x1a4   : > { %765 = vst.msk [vmem:[#allocation3 + $0x34] sm:$0x1] %vm373_vm2, %v751_v3  ;;  %1848 = vxpose.xlu1.b32.end [2/2] (short) (narrow) %v1846_v49, 16 }
 0x1a6   : > { %v1042_v56 = vpop.permute.xlu0 %1041 }
 0x1a7   : > { %v945_v7 = vpop.permute.xlu1 %944  ;;  %1056 = vst.msk [vmem:[#allocation3 + $0x37] sm:$0x1] %vm373_vm2, %v1042_v56 }
 0x1a8   : > { %959 = vst.msk [vmem:[#allocation3 + $0x36] sm:$0x1] %vm373_vm2, %v945_v7 }
 0x1aa   : > { %v1295_v24 = vpop.permute.xlu0 %1294 }
 0x1ab   : > { %v1198_v60 = vpop.permute.xlu1 %1197  ;;  %1310 = vst.msk [vmem:[#allocation3 + $0x2a] sm:$0x1] %vm373_vm2, %v1295_v24 }
 0x1ac   : > { %1213 = vst.msk [vmem:[#allocation3 + $0x29] sm:$0x1] %vm373_vm2, %v1198_v60 }
 0x1ae   : > { %v1489_v5 = vpop.permute.xlu0 %1488 }
 0x1af   : > { %v1392_v36 = vpop.permute.xlu1 %1391  ;;  %1504 = vst.msk [vmem:[#allocation3 + $0x2c] sm:$0x1] %vm373_vm2, %v1489_v5  ;;  %v1935_v50 = vld [vmem:[#allocation3 + $0x30] sm:$0xff] }
 0x1b0   : > { %1407 = vst.msk [vmem:[#allocation3 + $0x2b] sm:$0x1] %vm373_vm2, %v1392_v36  ;;  %v2468_v12 = vpack.i.bf16 %v1935_v50, %v1890_v40 }
 0x1b2   : > { %2469 = vxpose.xlu0.b32.start [1/2] (short) (narrow) %v2468_v12, 16  ;;  %v1683_v51 = vpop.permute.xlu0 %1682 }
 0x1b3   : > { %v1586_v30 = vpop.permute.xlu1 %1585  ;;  %1698 = vst.msk [vmem:[#allocation3 + $0x2e] sm:$0x1] %vm373_vm2, %v1683_v51 }
 0x1b4   : > { %1601 = vst.msk [vmem:[#allocation3 + $0x2d] sm:$0x1] %vm373_vm2, %v1586_v30 }
 0x1b6   : > { %v1200_v59 = vpop.permute.xlu0 %1199 }
 0x1b7   : > { %v1780_v16 = vpop.permute.xlu1 %1779  ;;  %1214 = vst.msk [vmem:[#allocation3 + $0x39] sm:$0x1] %vm373_vm2, %v1200_v59 }
 0x1b8   : > { %1795 = vst.msk [vmem:[#allocation3 + $0x2f] sm:$0x1] %vm373_vm2, %v1780_v16 }
 0x1ba   : > { %v1394_v63 = vpop.permute.xlu0 %1393 }
 0x1bb   : > { %v1297_v19 = vpop.permute.xlu1 %1296  ;;  %1408 = vst.msk [vmem:[#allocation3 + $0x3b] sm:$0x1] %vm373_vm2, %v1394_v63 }
 0x1bc   : > { %1311 = vst.msk [vmem:[#allocation3 + $0x3a] sm:$0x1] %vm373_vm2, %v1297_v19 }
 0x1be   : > { %v1588_v23 = vpop.permute.xlu0 %1587 }
 0x1bf   : > { %v1491_v55 = vpop.permute.xlu1 %1490  ;;  %1602 = vst.msk [vmem:[#allocation3 + $0x3d] sm:$0x1] %vm373_vm2, %v1588_v23  ;;  %v1891_v52 = vld [vmem:[#allocation3 + $0x28] sm:$0xff] }
 0x1c0   : > { %1505 = vst.msk [vmem:[#allocation3 + $0x3c] sm:$0x1] %vm373_vm2, %v1491_v55 }
 0x1c2   : > { %560 = vrot.lane.b32.xlu1 %v3514_v8, %s2532_s29  ;;  %v1782_v48 = vpop.permute.xlu0 %1781 }
 0x1c3   : > { %v1685_v47 = vpop.permute.xlu1 %1684  ;;  %1796 = vst.msk [vmem:[#allocation3 + $0x3f] sm:$0x1] %vm373_vm2, %v1782_v48 }
 0x1c4   : > { %1699 = vst.msk [vmem:[#allocation3 + $0x3e] sm:$0x1] %vm373_vm2, %v1685_v47 }
 0x1c6   : > { %657 = vrot.lane.b32.xlu1 %v3515_v61, %s2535_s6 }
 0x1ca   : > { %851 = vrot.lane.b32.xlu1 %v3516_v25, %s2537_s8 }
 0x1cb   : > { %v1936_v20 = vld [vmem:[#allocation3 + $0x38] sm:$0xff] }
 0x1cc   : > { %v2470_v1 = vpack.i.bf16 %v1936_v20, %v1891_v52 }
 0x1ce   : > { %1045 = vrot.lane.b32.xlu1 %v3517_v42, %s2538_s9  ;;  %2471 = vxpose.xlu0.b32.end [2/2] (short) (narrow) %v2470_v1, 16 }
 0x1d2   : > { %1300 = vrot.lane.b32.xlu1 %v3518_v10, %s2532_s29 }
 0x1d6   : > { %1494 = vrot.lane.b32.xlu1 %v3519_v4, %s2534_s5 }
 0x1da   : > { %1688 = vrot.lane.b32.xlu1 %v3520_v45, %s2536_s7 }
 0x1de   : > { %461 = vrot.lane.b32.xlu1 %v3005_v17, %s2533_s30 }
 0x1e2   : > { %655 = vrot.lane.b32.xlu1 %v3026_v26, %s2535_s6 }
 0x1f7   : > { %463 = vrot.lane.b32.xlu0 %v3521_v9, %s2533_s30 }
 0x1fb   : > { %754 = vrot.lane.b32.xlu0 %v3522_v31, %s2534_s5 }
 0x1ff   : > { %948 = vrot.lane.b32.xlu0 %v937_v28, %s2536_s7 }
 0x200   : > { %v1817_v46 = vpop.trf.xlu0 }
 0x201   : > { %v2411_v17 = vpack.c.bf16 %v1817_v46, %v1817_v46 }
 0x203   : > { %1203 = vrot.lane.b32.xlu0 %v3523_v2, %s2533_s30  ;;  %1842 = vst.msk [vmem:[#allocation4] sm:$0xf] %vm1841_vm3, %v2411_v17 }
 0x204   : > { %v1818_v26 = vpop.trf.xlu0 }
 0x205   : > { %v2412_v15 = vpack.c.bf16 %v1818_v26, %v1818_v26 }
 0x207   : > { %1397 = vrot.lane.b32.xlu0 %v3524_v34, %s2535_s6  ;;  %1843 = vst.msk [vmem:[#allocation4 + $0x4] sm:$0xf] %vm1841_vm3, %v2412_v15 }
 0x20b   : > { %1591 = vrot.lane.b32.xlu0 %v3525_v44, %s2537_s8 }
 0x20e   : > { %v2500_v39 = vld [vmem:[#allocation4] sm:$0xff]  }
 0x20f   : > { %1785 = vrot.lane.b32.xlu0 %v3526_v38, %s2538_s9  ;;  %v2109_v18 = vsel %vm2101_vm4, %v2500_v39, 0 }
 0x213   : > { %558 = vrot.lane.b32.xlu0 %v3072_v33, %s2532_s29 }
 0x21c   : > { %v1863_v28 = vpop.trf.xlu1 }
 0x21d   : > { %v2413_v22 = vpack.c.bf16 %v1863_v28, %v1863_v28 }
 0x21f   : > { %1887 = vst.msk [vmem:[#allocation4 + $0x8] sm:$0xf] %vm1841_vm3, %v2413_v22 }
 0x220   : > { %v1864_v6 = vpop.trf.xlu1 }
 0x221   : > { %v2414_v29 = vpack.c.bf16 %v1864_v6, %v1864_v6 }
 0x223   : > { %1888 = vst.msk [vmem:[#allocation4 + $0xc] sm:$0xf] %vm1841_vm3, %v2414_v29 }
 0x22a   : > { %v2499_v58 = vld [vmem:[#allocation4 + $0x8] sm:$0xff]  }
 0x22b   : > { %2447 = vmatprep.subr.msk.bf16.mxu1 %vm2101_vm4, %v2499_v58  ;;  %v2112_v27 = vsel %vm2101_vm4, %v2499_v58, 0 }
 0x22c   : > { %2432 = vmatpush3.bf16.xpose.msra.mxu1 %v2112_v27 }
 0x22d   : > { %2448 = vmatprep.subr.msk.bf16.mxu1 %vm2101_vm4, %v2500_v39 }
 0x234   : > { %v561_v33 = vpop.permute.xlu1 %560  ;;  %2434 = vmatpush3.bf16.xpose.msra.mxu1 %v2109_v18 }
 0x235   : > { %573 = vst.msk [vmem:[#allocation3 + $0x52] sm:$0x1] %vm373_vm2, %v561_v33 }
 0x238   : > { %v658_v57 = vpop.permute.xlu1 %657 }
 0x239   : > { %670 = vst.msk [vmem:[#allocation3 + $0x53] sm:$0x1] %vm373_vm2, %v658_v57 }
 0x23c   : > { %v852_v62 = vpop.permute.xlu1 %851 }
 0x23d   : > { %864 = vst.msk [vmem:[#allocation3 + $0x55] sm:$0x1] %vm373_vm2, %v852_v62 }
 0x240   : > { %v1046_v11 = vpop.permute.xlu1 %1045 }
 0x241   : > { %1058 = vst.msk [vmem:[#allocation3 + $0x57] sm:$0x1] %vm373_vm2, %v1046_v11 }
 0x244   : > { %v1301_v3 = vpop.permute.xlu1 %1300 }
 0x245   : > { %1313 = vst.msk [vmem:[#allocation3 + $0x5a] sm:$0x1] %vm373_vm2, %v1301_v3 }
 0x246   : > { %v2472_v49 = vpop.trf.xlu0 }
 0x247   : > { %v2476_v56 = vunpack.i.h.bf16 %v2472_v49  ;;  %v2473_v7 = vunpack.i.l.bf16 %v2472_v49 }
 0x248   : > { %v1495_v24 = vpop.permute.xlu1 %1494 }
 0x249   : > { %v2417_v60 = vpack.c.bf16 %v2476_v56, %v2476_v56  ;;  %v2415_v5 = vpack.c.bf16 %v2473_v7, %v2473_v7  ;;  %1507 = vst.msk [vmem:[#allocation3 + $0x5c] sm:$0x1] %vm373_vm2, %v1495_v24 }
 0x24a   : > { %v2477_v36 = vpop.trf.xlu0 }
 0x24b   : > { %1977 = vst.msk [vmem:[#allocation4 + $0x18] sm:$0xf] %vm1841_vm3, %v2417_v60  ;;  %1932 = vst.msk [vmem:[#allocation4 + $0x10] sm:$0xf] %vm1841_vm3, %v2415_v5  ;;  %v2481_v40 = vunpack.i.h.bf16 %v2477_v36  ;;  %v2478_v50 = vunpack.i.l.bf16 %v2477_v36 }
 0x24c   : > { %v1689_v12 = vpop.permute.xlu1 %1688 }
 0x24d   : > { %v2418_v51 = vpack.c.bf16 %v2481_v40, %v2481_v40  ;;  %v2416_v30 = vpack.c.bf16 %v2478_v50, %v2478_v50  ;;  %1701 = vst.msk [vmem:[#allocation3 + $0x5e] sm:$0x1] %vm373_vm2, %v1689_v12 }
 0x24f   : > { %1978 = vst.msk [vmem:[#allocation4 + $0x1c] sm:$0xf] %vm1841_vm3, %v2418_v51  ;;  %1933 = vst.msk [vmem:[#allocation4 + $0x14] sm:$0xf] %vm1841_vm3, %v2416_v30 }
 0x250   : > { %v462_v59 = vpop.permute.xlu1 %461 }
 0x251   : > { %475 = vst.msk [vmem:[#allocation3 + $0x41] sm:$0x1] %vm373_vm2, %v462_v59 }
 0x254   : > { %v656_v16 = vpop.permute.xlu1 %655 }
 0x255   : > { %669 = vst.msk [vmem:[#allocation3 + $0x43] sm:$0x1] %vm373_vm2, %v656_v16 }
 0x256   : > { %v2501_v63 = vld [vmem:[#allocation4 + $0x10] sm:$0xff]   ;;  %v2502_v19 = vld [vmem:[#allocation4 + $0x18] sm:$0xff]  }
 0x257   : > { %2435 = vmatprep.mubr.msk.bf16.mxu1 %vm2101_vm4, %v2501_v63 }
 0x258   : > { %2436 = vmatmul.mubr.msk.bf16.vlgmr.msra.gmra.mxu1 %vm2101_vm4, %v2502_v19 }
 0x269   : > { %v464_v23 = vpop.permute.xlu0 %463 }
 0x26a   : > { %476 = vst.msk [vmem:[#allocation3 + $0x51] sm:$0x1] %vm373_vm2, %v464_v23 }
 0x26d   : > { %v755_v55 = vpop.permute.xlu0 %754 }
 0x26e   : > { %767 = vst.msk [vmem:[#allocation3 + $0x54] sm:$0x1] %vm373_vm2, %v755_v55 }
 0x271   : > { %v949_v8 = vpop.permute.xlu0 %948 }
 0x272   : > { %961 = vst.msk [vmem:[#allocation3 + $0x56] sm:$0x1] %vm373_vm2, %v949_v8 }
 0x275   : > { %v1204_v48 = vpop.permute.xlu0 %1203 }
 0x276   : > { %1216 = vst.msk [vmem:[#allocation3 + $0x59] sm:$0x1] %vm373_vm2, %v1204_v48 }
 0x279   : > { %v1398_v47 = vpop.permute.xlu0 %1397  ;;  %v2025_v3 = vld [vmem:[#allocation3 + $0x50] sm:$0xff] }
 0x27a   : > { %1410 = vst.msk [vmem:[#allocation3 + $0x5b] sm:$0x1] %vm373_vm2, %v1398_v47 }
 0x27d   : > { %v1592_v61 = vpop.permute.xlu0 %1591 }
 0x27e   : > { %1604 = vst.msk [vmem:[#allocation3 + $0x5d] sm:$0x1] %vm373_vm2, %v1592_v61 }
 0x281   : > { %v1786_v25 = vpop.permute.xlu0 %1785 }
 0x282   : > { %1798 = vst.msk [vmem:[#allocation3 + $0x5f] sm:$0x1] %vm373_vm2, %v1786_v25 }
 0x285   : > { %v559_v52 = vpop.permute.xlu0 %558 }
 0x286   : > { %572 = vst.msk [vmem:[#allocation3 + $0x42] sm:$0x1] %vm373_vm2, %v559_v52 }
 0x289   : > { %v2026_v49 = vld [vmem:[#allocation3 + $0x58] sm:$0xff] }
 0x318   : > { %v2437_v20 = vpop.f32.mrf.mxu1 }
 0x319   : > { %v2170_v1 = vsel %vm2163_vm5, %v2437_v20, -inf }
 0x31a   : > { %2171 = vmax.xlane.f32.xlu1 %v2170_v1  ;;  %v2148_v42 = vpop.f32.mrf.mxu1 }
 0x31b   : > { %v2164_v4 = vsel %vm2163_vm5, %v2148_v42, -inf }
 0x31c   : > { %v2438_v10 = vpop.f32.mrf.mxu1 }
 0x31d   : > { %v2173_v31 = vsel %vm2163_vm5, %v2438_v10, -inf }
 0x31e   : > { %2165 = vmax.xlane.f32.xlu1 %v2164_v4  ;;  %v2151_v45 = vpop.f32.mrf.mxu1 }
 0x31f   : > { %v2167_v9 = vsel %vm2163_vm5, %v2151_v45, -inf }
 0x320   : > { %2168 = vmax.xlane.f32.xlu0 %v2167_v9 }
 0x322   : > { %2174 = vmax.xlane.f32.xlu1 %v2173_v31 }
 0x333   : > { %849 = vrot.lane.b32.xlu1 %v3100_v21, %s2537_s8 }
 0x336   : > { %752 = vrot.lane.b32.xlu0 %v3107_v0, %s2534_s5 }
 0x337   : > { %1043 = vrot.lane.b32.xlu1 %v3114_v13, %s2538_s9 }
 0x33a   : > { %946 = vrot.lane.b32.xlu0 %v3122_v37, %s2536_s7 }
 0x33b   : > { %1298 = vrot.lane.b32.xlu1 %v3125_v54, %s2532_s29 }
 0x33e   : > { %1201 = vrot.lane.b32.xlu0 %v3128_v43, %s2533_s30 }
 0x33f   : > { %1492 = vrot.lane.b32.xlu1 %v3136_v53, %s2534_s5 }
 0x342   : > { %1395 = vrot.lane.b32.xlu0 %v3139_v41, %s2535_s6 }
 0x343   : > { %1686 = vrot.lane.b32.xlu1 %v3142_v14, %s2536_s7 }
 0x346   : > { %1589 = vrot.lane.b32.xlu0 %v3148_v32, %s2537_s8 }
 0x34a   : > { %1783 = vrot.lane.b32.xlu0 %v3169_v35, %s2538_s9 }
 0x3a3   : > { %v2172_v13 = vpop.xlane.xlu1 %2171 }
 0x3a4   : > { %v2178_v21 = vsub.f32 %v2437_v20, %v2172_v13 }
 0x3a6   : > { %v2184_v0 = vmul.f32 1.442695, %v2178_v21 }
 0x3a7   : > { %v2166_v37 = vpop.xlane.xlu1 %2165 }
 0x3a8   : > { %2505 = vpow2.f32 %v2184_v0  ;;  %v2176_v54 = vsub.f32 %v2148_v42, %v2166_v37 }
 0x3a9   : > { %v2169_v43 = vpop.xlane.xlu0 %2168 }
 0x3aa   : > { %v2180_v53 = vmul.f32 1.442695, %v2176_v54  ;;  %v2177_v46 = vsub.f32 %v2151_v45, %v2169_v43 }
 0x3ab   : > { %v2175_v17 = vpop.xlane.xlu1 %2174 }
 0x3ac   : > { %2507 = vpow2.f32 %v2180_v53  ;;  %v2182_v41 = vmul.f32 1.442695, %v2177_v46  ;;  %v2179_v2 = vsub.f32 %v2438_v10, %v2175_v17 }
 0x3ad   : > { %v753_v14 = vpop.permute.xlu0 %752 }
 0x3ae   : > { %2509 = vpow2.f32 %v2182_v41  ;;  %v2186_v26 = vmul.f32 1.442695, %v2179_v2  ;;  %766 = vst.msk [vmem:[#allocation3 + $0x44] sm:$0x1] %vm373_vm2, %v753_v14 }
 0x3af   : > { %v850_v32 = vpop.permute.xlu1 %849 }
 0x3b0   : > { %2511 = vpow2.f32 %v2186_v26  ;;  %863 = vst.msk [vmem:[#allocation3 + $0x45] sm:$0x1] %vm373_vm2, %v850_v32 }
 0x3b1   : > { %v947_v35 = vpop.permute.xlu0 %946 }
 0x3b2   : > { %960 = vst.msk [vmem:[#allocation3 + $0x46] sm:$0x1] %vm373_vm2, %v947_v35 }
 0x3b3   : > { %v1044_v15 = vpop.permute.xlu1 %1043 }
 0x3b4   : > { %1057 = vst.msk [vmem:[#allocation3 + $0x47] sm:$0x1] %vm373_vm2, %v1044_v15 }
 0x3b5   : > { %v3464_v34 = vpop.eup %2505  ;;  %v1202_v44 = vpop.permute.xlu0 %1201 }
 0x3b6   : > { %1215 = vst.msk [vmem:[#allocation3 + $0x49] sm:$0x1] %vm373_vm2, %v1202_v44  ;;  %v2194_v38 = vsel %vm2163_vm5, %v3464_v34, 0.0 }
 0x3b7   : > { %v1299_v28 = vpop.permute.xlu1 %1298  ;;  %2195 = vadd.xlane.f32.xlu0 %v2194_v38 }
 0x3b8   : > { %1312 = vst.msk [vmem:[#allocation3 + $0x4a] sm:$0x1] %vm373_vm2, %v1299_v28 }
 0x3b9   : > { %v2508_v22 = vpop.eup %2507  ;;  %v1396_v6 = vpop.permute.xlu0 %1395 }
 0x3ba   : > { %1409 = vst.msk [vmem:[#allocation3 + $0x4b] sm:$0x1] %vm373_vm2, %v1396_v6  ;;  %v2188_v29 = vsel %vm2163_vm5, %v2508_v22, 0.0 }
 0x3bb   : > { %v2510_v58 = vpop.eup %2509  ;;  %2189 = vadd.xlane.f32.xlu1 %v2188_v29  ;;  %v1493_v39 = vpop.permute.xlu1 %1492  ;;  %v1980_v56 = vld [vmem:[#allocation3 + $0x40] sm:$0xff] }
 0x3bc   : > { %1506 = vst.msk [vmem:[#allocation3 + $0x4c] sm:$0x1] %vm373_vm2, %v1493_v39  ;;  %v2191_v27 = vsel %vm2163_vm5, %v2510_v58, 0.0 }
 0x3bd   : > { %v2512_v18 = vpop.eup %2511  ;;  %2192 = vadd.xlane.f32.xlu0 %v2191_v27  ;;  %v1590_v33 = vpop.permute.xlu0 %1589 }
 0x3be   : > { %1603 = vst.msk [vmem:[#allocation3 + $0x4d] sm:$0x1] %vm373_vm2, %v1590_v33  ;;  %v2197_v57 = vsel %vm2163_vm5, %v2512_v18, 0.0 }
 0x3bf   : > { %2198 = vadd.xlane.f32.xlu1 %v2197_v57  ;;  %v1687_v62 = vpop.permute.xlu1 %1686 }
 0x3c0   : > { %1700 = vst.msk [vmem:[#allocation3 + $0x4e] sm:$0x1] %vm373_vm2, %v1687_v62 }
 0x3c1   : > { %v1784_v11 = vpop.permute.xlu0 %1783 }
 0x3c2   : > { %1797 = vst.msk [vmem:[#allocation3 + $0x4f] sm:$0x1] %vm373_vm2, %v1784_v11 }
 0x3c9   : > { %v1981_v7 = vld [vmem:[#allocation3 + $0x48] sm:$0xff] }
 0x3ea   : > { %2027 = vxpose.xlu0.b32.start [1/2] (short) (narrow) %v2025_v3, 16 }
 0x3ee   : > { %2028 = vxpose.xlu0.b32.end [2/2] (short) (narrow) %v2026_v49, 16 }
 0x3f2   : > { %1982 = vxpose.xlu1.b32.start [1/2] (short) (narrow) %v1980_v56, 16 }
 0x3f6   : > { %1983 = vxpose.xlu1.b32.end [2/2] (short) (narrow) %v1981_v7, 16 }
 0x440   : > { %v2196_v24 = vpop.xlane.xlu0 %2195 }
 0x444   : > { %v2190_v60 = vpop.xlane.xlu1 %2189 }
 0x445   : > { %2513 = vrcp.f32 %v2190_v60 }
 0x446   : > { %v2193_v5 = vpop.xlane.xlu0 %2192 }
 0x447   : > { %2515 = vrcp.f32 %v2193_v5 }
 0x448   : > { %v2199_v16 = vpop.xlane.xlu1 %2198 }
 0x449   : > { %2517 = vrcp.f32 %v2199_v16 }
 0x44a   : > { %2519 = vrcp.f32 %v2196_v24 }
 0x452   : > { %v2514_v36 = vpop.eup %2513 }
 0x453   : > { %v2204_v50 = vmul.f32 %v2514_v36, %v2508_v22 }
 0x454   : > { %v2516_v40 = vpop.eup %2515 }
 0x455   : > { %v2205_v12 = vmul.f32 %v2516_v40, %v2510_v58 }
 0x456   : > { %v2518_v61 = vpop.eup %2517 }
 0x457   : > { %v2208_v51 = vpack.c.bf16 %v2205_v12, %v2204_v50  ;;  %v2520_v25 = vpop.eup %2519  ;;  %v2207_v20 = vmul.f32 %v2518_v61, %v2512_v18 }
 0x458   : > { %v2206_v1 = vmul.f32 %v2520_v25, %v3464_v34 }
 0x459   : > { %2443 = vmatprep.mubr.msk.bf16.mxu0 %vm2163_vm5, %v2208_v51 }
 0x45a   : > { %v2209_v42 = vpack.c.bf16 %v2207_v20, %v2206_v1 }
 0x466   : > { %v2043_v30 = vpop.trf.xlu0 }
 0x467   : > { %v2421_v59 = vpack.c.bf16 %v2043_v30, %v2043_v30 }
 0x469   : > { %2067 = vst.msk [vmem:[#allocation4 + $0x28] sm:$0xf] %vm1841_vm3, %v2421_v59 }
 0x46a   : > { %v2044_v63 = vpop.trf.xlu0 }
 0x46b   : > { %v2422_v19 = vpack.c.bf16 %v2044_v63, %v2044_v63 }
 0x46d   : > { %2068 = vst.msk [vmem:[#allocation4 + $0x2c] sm:$0xf] %vm1841_vm3, %v2422_v19 }
 0x46e   : > { %v1998_v23 = vpop.trf.xlu1 }
 0x46f   : > { %v2419_v55 = vpack.c.bf16 %v1998_v23, %v1998_v23 }
 0x471   : > { %2022 = vst.msk [vmem:[#allocation4 + $0x20] sm:$0xf] %vm1841_vm3, %v2419_v55 }
 0x472   : > { %v1999_v8 = vpop.trf.xlu1 }
 0x473   : > { %v2420_v48 = vpack.c.bf16 %v1999_v8, %v1999_v8 }
 0x474   : > { %v2503_v47 = vld [vmem:[#allocation4 + $0x28] sm:$0xff]  }
 0x475   : > { %2023 = vst.msk [vmem:[#allocation4 + $0x24] sm:$0xf] %vm1841_vm3, %v2420_v48  ;;  %2439 = vmatprep.subr.bf16.mxu0 %v2503_v47 }
 0x476   : > { %2440 = vmatpush3.bf16.msra.mxu0 %v2503_v47 }
 0x47c   : > { %v2504_v52 = vld [vmem:[#allocation4 + $0x20] sm:$0xff]  }
 0x47d   : > { %2441 = vmatprep.subr.bf16.mxu0 %v2504_v52 }
 0x47e   : > { %2442 = vmatpush3.bf16.msra.mxu0 %v2504_v52 }
 0x481   : > { %2444 = vmatmul.mubr.msk.bf16.vlgmr.msra.gmra.mxu0 %vm2163_vm5, %v2209_v42 }
 0x541   : > { %v2445_v10 = vpop.f32.mrf.mxu0 }
 0x542   : > { %2279 = vst.msk [vmem:[%s205_s13 + $0x10] sm:$0xff] %vm2101_vm4, %v2445_v10 }
 0x543   : > { %v2262_v4 = vpop.f32.mrf.mxu0 }
 0x544   : > { %2277 = vst.msk [vmem:[%s205_s13] sm:$0xff] %vm2101_vm4, %v2262_v4 }
 0x545   : > { %v2446_v45 = vpop.f32.mrf.mxu0 }
 0x546   : > { %2280 = vst.msk [vmem:[%s205_s13 + $0x18] sm:$0xff] %vm2101_vm4, %v2446_v45 }
 0x547   : > { %v2265_v9 = vpop.f32.mrf.mxu0 }
 0x548   : > { %2278 = vst.msk [vmem:[%s205_s13 + $0x8] sm:$0xff] %vm2101_vm4, %v2265_v9 }
 0x549 PF: > { %s15_s15 = sadd.s32 1, %s2527_s15  }
 0x54a   : > { %p12_p4 = scmp.ge.s32.totalorder %s15_s15, 4  }
 0x54c   :  { %14 = sbr.rel (!%p12_p4) target bundleno = 1 (0x1), region = 79 }

</bundles_post_ra>
